<compile_context>
chip_gen: v5e
topology: v5e:2x2
jax: 0.10.0
libtpu: 0.0.40
codegen_flags: <defaults>
</compile_context>

<pallas_src>
import numpy as np
import jax
import jax.numpy as jnp
from jax.experimental import pallas as pl
from jax.experimental.pallas import tpu as pltpu


def _make_decoder_kernel(H, W, Cin, Cout, TH):
    """Kernel body closed over static shape parameters.

    Phase decomposition of ConvTranspose2d(k=4, s=2, p=1): output phase (ph, pw) at
    half-res pixel (p, q) is
        sum_{r,c in {0,1}} x_pad[p+ph+r, q+pw+c, :] @ W[:, :, 3-ph-2r, 3-pw-2c]
    i.e. four stride-1 2x2 convs over the un-dilated input, bias + ReLU fused in.
    """
    per_tap_matmul = Cin >= 128        # skip im2col concat; 4 accumulating K=Cin matmuls
    direct_store = (Cout % 128) == 0   # lane-aligned per-phase stores into o_ref

    def kernel(xp_ref, w_ref, b_ref, o_ref):
        # xp_ref: (1, H+2, W+2, Cin)  padded NHWC image for batch n (bf16)
        # w_ref : (4, 4*Cin, Cout)    per-phase flattened 2x2 conv weights (bf16)
        # b_ref : (1, Cout)           bias (f32)
        # o_ref : (1, TH*W, 4*Cout)   row-tile output, 4 phases packed on lanes (bf16)
        t = pl.program_id(1)
        row0 = pl.multiple_of(t * TH, TH)

        # One dynamic windowed read per grid step; all tap slices below are static.
        xw = xp_ref[0, pl.ds(row0, TH + 2), :, :]              # (TH+2, W+2, Cin)

        # Hoisted bias broadcast (reused by all 4 phases).
        bias = jnp.broadcast_to(b_ref[...], (TH * W, Cout))    # f32

        packed = []
        for ph in (0, 1):
            for pw in (0, 1):
                k = 2 * ph + pw
                if per_tap_matmul:
                    acc = None
                    for ti, (r, c) in enumerate(((0, 0), (0, 1), (1, 0), (1, 1))):
                        tap = xw[ph + r:ph + r + TH, pw + c:pw + c + W, :]
                        tap = tap.reshape(TH * W, Cin)
                        part = jnp.dot(tap, w_ref[k, ti * Cin:(ti + 1) * Cin, :],
                                       preferred_element_type=jnp.float32)
                        acc = part if acc is None else acc + part
                else:
                    taps = [xw[ph + r:ph + r + TH, pw + c:pw + c + W, :]
                            for r in (0, 1) for c in (0, 1)]
                    patch = jnp.concatenate(taps, axis=-1).reshape(TH * W, 4 * Cin)
                    acc = jnp.dot(patch, w_ref[k],
                                  preferred_element_type=jnp.float32)
                y = jnp.maximum(acc + bias, 0.0).astype(o_ref.dtype)   # fused bias+ReLU
                if direct_store:
                    o_ref[0, :, k * Cout:(k + 1) * Cout] = y
                else:
                    packed.append(y)

        if not direct_store:
            # Small Cout: one lane-dense wide store of the 4 packed (bf16) phases.
            o_ref[0] = jnp.concatenate(packed, axis=-1)

    return kernel


def _choose_row_tile(H, W, Cin, Cout, row_tile, vmem_budget_bytes=8 << 20):
    """Pick the row-tile height TH (divides H; TH*W multiple of 8 unless TH == H)."""
    if row_tile is not None:
        assert H % row_tile == 0, "row_tile must divide H"
        assert row_tile == H or (row_tile * W) % 8 == 0, \
            "row_tile * W must be a multiple of 8 (TPU sublane tiling)"
        return row_tile

    def est(th):  # rough per-step live bytes
        win = (th + 2) * (W + 2) * Cin * 2
        tmp = th * W * (Cin if Cin >= 128 else 4 * Cin) * 2
        acc = th * W * Cout * 4
        if Cout % 128 != 0:
            acc += th * W * 4 * Cout * 2
        outblk = 2 * th * W * 4 * Cout * 2
        return win + tmp + acc + outblk

    candidates = [d for d in range(1, H + 1)
                  if H % d == 0 and (d == H or (d * W) % 8 == 0)]
    for d in sorted(candidates, reverse=True):
        if est(d) <= vmem_budget_bytes:
            return d
    return min(candidates)


def decoder_block_forward(x_nchw, weight, bias, *, kernel_size=4, stride=2,
                          padding=1, row_tile=None, unpack=True):
    """DecoderBlock.forward (eval mode): ConvTranspose2d(k=4,s=2,p=1) -> Dropout(id) -> ReLU.

    weight: [Cin, Cout, K, K] (PyTorch ConvTranspose2d layout), bias: [Cout].
    Returns NCHW bf16 (2H, 2W) if unpack=True, else the packed (N, H*W, 4*Cout)
    phase layout (keep packed across a decoder stack, unpack once at the end).
    """
    assert kernel_size == 4 and stride == 2 and padding == 1, \
        "phase-decomposed kernel is specialized to ConvTranspose2d(k=4, s=2, p=1)"
    N, Cin, H, W = x_nchw.shape
    Cout = weight.shape[1]
    TH = _choose_row_tile(H, W, Cin, Cout, row_tile)
    T = H // TH

    # ---- JAX glue: layout + tiny weight repack only (no im2col in HBM) ----
    x = jnp.transpose(x_nchw, (0, 2, 3, 1)).astype(jnp.bfloat16)
    xp = jnp.pad(x, ((0, 0), (1, 1), (1, 1), (0, 0)))            # (N, H+2, W+2, Cin)

    # Sub-pixel weights: phase (ph, pw), tap (r, c) uses weight[:, :, 3-ph-2r, 3-pw-2c].
    w_phases = []
    for ph in (0, 1):
        for pw in (0, 1):
            taps = [weight[:, :, 3 - ph - 2 * r, 3 - pw - 2 * c]   # (Cin, Cout)
                    for r in (0, 1) for c in (0, 1)]
            w_phases.append(jnp.concatenate(taps, axis=0))         # (4*Cin, Cout)
    w_ph = jnp.stack(w_phases, axis=0).astype(jnp.bfloat16)        # (4, 4*Cin, Cout)
    b2 = bias.reshape(1, Cout).astype(jnp.float32)

    kernel = _make_decoder_kernel(H, W, Cin, Cout, TH)

    # VMEM budget: padded-input block (x2 buffers) + weights/bias + bf16 output block (x2)
    # + in-kernel temps. Clamp to [32 MiB, 110 MiB].
    vmem_need = (2 * (H + 2) * (W + 2) * Cin * 2
                 + 4 * 4 * Cin * Cout * 2 + Cout * 4
                 + 2 * TH * W * 4 * Cout * 2
                 + TH * W * (4 * Cin * 2 + Cout * 4 + 4 * Cout * 2))
    vmem_limit = int(min(110 << 20, max(32 << 20, 2 * vmem_need)))

    out = pl.pallas_call(
        kernel,
        out_shape=jax.ShapeDtypeStruct((N, H * W, 4 * Cout), jnp.bfloat16),
        grid_spec=pltpu.PrefetchScalarGridSpec(
            num_scalar_prefetch=0,
            grid=(N, T),
            in_specs=[
                # Full padded image per batch element; index map ignores t, so the slab
                # stays resident across the row-tile axis (re-DMA only when n changes).
                pl.BlockSpec((1, H + 2, W + 2, Cin), lambda n, t: (n, 0, 0, 0)),
                pl.BlockSpec((4, 4 * Cin, Cout), lambda n, t: (0, 0, 0)),
                pl.BlockSpec((1, Cout), lambda n, t: (0, 0)),
            ],
            out_specs=pl.BlockSpec((1, TH * W, 4 * Cout), lambda n, t: (n, t, 0)),
        ),
        compiler_params=pltpu.CompilerParams(
            # Both axes independent -> shards across v7x's 2 TensorCores even when N == 1.
            dimension_semantics=("parallel", "parallel"),
            vmem_limit_bytes=vmem_limit,
        ),
    )(xp, w_ph, b2)

    if not unpack:
        return out

    # Interleave phases back to NCHW:
    #   out[n, p*W+q, (2*ph+pw)*Cout + co] -> y[n, co, 2p+ph, 2q+pw]
    y = out.reshape(N, H, W, 2, 2, Cout)
    y = jnp.transpose(y, (0, 5, 1, 3, 2, 4))
    return y.reshape(N, Cout, 2 * H, 2 * W)


def reference_forward(x, weight, bias, kernel_size=4, stride=2, padding=1):
    """Direct scatter-based ConvTranspose2d + bias + ReLU reference (numpy, f32)."""
    x = np.asarray(x, np.float32)
    weight = np.asarray(weight, np.float32)
    bias = np.asarray(bias, np.float32)
    N, Cin, H, W = x.shape
    K = kernel_size
    Cout = weight.shape[1]
    Hf = (H - 1) * stride + K
    Wf = (W - 1) * stride + K
    full = np.zeros((N, Cout, Hf, Wf), np.float32)
    for ih in range(H):
        for iw in range(W):
            contrib = np.einsum('nc,cokl->nokl', x[:, :, ih, iw], weight)
            full[:, :, ih * stride:ih * stride + K, iw * stride:iw * stride + K] += contrib
    Hout = Hf - 2 * padding
    Wout = Wf - 2 * padding
    out = full[:, :, padding:padding + Hout, padding:padding + Wout]
    out = out + bias[None, :, None, None]
    return np.maximum(out, 0.0)


if __name__ == "__main__":
    def run_case(N, Cin, Cout, H, W, row_tile, key):
        kx, kw, kb = jax.random.split(key, 3)
        x = jax.random.normal(kx, (N, Cin, H, W), jnp.float32)
        # ConvTranspose2d weight layout: [Cin, Cout, K, K]
        weight = jax.random.normal(kw, (Cin, Cout, 4, 4), jnp.float32) * 0.1
        bias = jax.random.normal(kb, (Cout,), jnp.float32) * 0.1

        y = decoder_block_forward(x, weight, bias, row_tile=row_tile)
        y = jax.block_until_ready(y)
        assert y.shape == (N, Cout, 2 * H, 2 * W), y.shape

        # Reference uses bf16-quantized inputs/weights (kernel runs bf16 with f32
        # accumulation and a bf16 output); tolerance reflects the bf16 output cast.
        x_q = np.asarray(x.astype(jnp.bfloat16).astype(jnp.float32))
        w_q = np.asarray(weight.astype(jnp.bfloat16).astype(jnp.float32))
        y_ref = reference_forward(x_q, w_q, bias)
        y_f32 = np.asarray(y.astype(jnp.float32))
        err = np.max(np.abs(y_f32 - y_ref))
        assert np.allclose(y_f32, y_ref, rtol=2e-2, atol=2e-2), f"max abs err {err}"

    key = jax.random.PRNGKey(0)
    k1, k2 = jax.random.split(key)
    # Small channels: exercises the im2col-concat matmul + packed single-wide-store path,
    # with explicit row tiling (2 row tiles per image).
    run_case(N=2, Cin=4, Cout=8, H=16, W=16, row_tile=8, key=k1)
    # MXU-friendly channels: exercises the per-tap accumulating-matmul path and the
    # lane-aligned direct per-phase stores (Cin, Cout multiples of 128).
    run_case(N=1, Cin=128, Cout=128, H=8, W=8, row_tile=None, key=k2)

    print("KERNEL_OK")
</pallas_src>

<mosaic_0001>
module attributes {stable_mosaic.version = 11 : i64} {
  func.func @kernel(%arg0: i32, %arg1: i32, %arg2: memref<1x18x18x4xbf16, #tpu.memory_space<vmem>>, %arg3: memref<4x16x8xbf16, #tpu.memory_space<vmem>>, %arg4: memref<1x8xf32, #tpu.memory_space<vmem>>, %arg5: memref<1x128x32xbf16, #tpu.memory_space<vmem>>) attributes {dimension_semantics = [#tpu.dimension_semantics<parallel>, #tpu.dimension_semantics<parallel>], iteration_bounds = array<i64: 2, 2>, scalar_prefetch = 0 : i64, scratch_operands = 0 : i64, tpu.core_type = #tpu.core_type<tc>, window_params = [{transform_indices = @transform_0, window_bounds = array<i64: 1, 18, 18, 4>}, {pipeline_mode = #tpu.pipeline_mode<synchronous>, transform_indices = @transform_1, window_bounds = array<i64: 4, 16, 8>}, {pipeline_mode = #tpu.pipeline_mode<synchronous>, transform_indices = @transform_2, window_bounds = array<i64: 1, 8>}, {transform_indices = @transform_3, window_bounds = array<i64: 1, 128, 32>}]} {
    %c8_i32 = arith.constant 8 : i32
    %0 = arith.muli %arg1, %c8_i32 : i32
    %1 = tpu.assume_multiple %0, 8 : i32
    %c0 = arith.constant 0 : index
    %2 = arith.index_cast %1 : i32 to index
    %c0_0 = arith.constant 0 : index
    %c0_1 = arith.constant 0 : index
    %3 = vector.load %arg2[%c0, %2, %c0_0, %c0_1] : memref<1x18x18x4xbf16, #tpu.memory_space<vmem>>, vector<1x10x18x4xbf16>
    %4 = vector.shape_cast %3 : vector<1x10x18x4xbf16> to vector<10x18x4xbf16>
    %c0_2 = arith.constant 0 : index
    %c0_3 = arith.constant 0 : index
    %5 = vector.load %arg4[%c0_2, %c0_3] : memref<1x8xf32, #tpu.memory_space<vmem>>, vector<1x8xf32>
    %6 = vector.shape_cast %5 : vector<1x8xf32> to vector<1x8xf32>
    %7 = vector.broadcast %6 : vector<1x8xf32> to vector<128x8xf32>
    %8 = vector.extract_strided_slice %4 {offsets = [0, 0, 0], sizes = [8, 16, 4], strides = [1, 1, 1]} : vector<10x18x4xbf16> to vector<8x16x4xbf16>
    %9 = vector.extract_strided_slice %4 {offsets = [0, 1, 0], sizes = [8, 16, 4], strides = [1, 1, 1]} : vector<10x18x4xbf16> to vector<8x16x4xbf16>
    %10 = vector.extract_strided_slice %4 {offsets = [1, 0, 0], sizes = [8, 16, 4], strides = [1, 1, 1]} : vector<10x18x4xbf16> to vector<8x16x4xbf16>
    %11 = vector.extract_strided_slice %4 {offsets = [1, 1, 0], sizes = [8, 16, 4], strides = [1, 1, 1]} : vector<10x18x4xbf16> to vector<8x16x4xbf16>
    %12 = tpu.concatenate %8, %9, %10, %11 in 2 : vector<8x16x4xbf16>, vector<8x16x4xbf16>, vector<8x16x4xbf16>, vector<8x16x4xbf16> -> vector<8x16x16xbf16>
    %13 = vector.shape_cast %12 : vector<8x16x16xbf16> to vector<128x16xbf16>
    %c0_4 = arith.constant 0 : index
    %c0_5 = arith.constant 0 : index
    %c0_6 = arith.constant 0 : index
    %14 = vector.load %arg3[%c0_4, %c0_5, %c0_6] : memref<4x16x8xbf16, #tpu.memory_space<vmem>>, vector<1x16x8xbf16>
    %15 = vector.shape_cast %14 : vector<1x16x8xbf16> to vector<16x8xbf16>
    %cst = arith.constant dense<0.000000e+00> : vector<128x8xf32>
    %16 = tpu.matmul %13, %15, %cst {dimension_numbers = #tpu.dot_dimension_numbers<[1], [0], [0], [1], [0, 0, 1, 1], [], []>} : vector<128x16xbf16>, vector<16x8xbf16>, vector<128x8xf32> -> vector<128x8xf32>
    %17 = arith.addf %16, %7 : vector<128x8xf32>
    %cst_7 = arith.constant 0.000000e+00 : f32
    %18 = vector.broadcast %cst_7 : f32 to vector<128x8xf32>
    %19 = arith.maximumf %17, %18 : vector<128x8xf32>
    %20 = arith.truncf %19 : vector<128x8xf32> to vector<128x8xbf16>
    %21 = vector.extract_strided_slice %4 {offsets = [0, 1, 0], sizes = [8, 16, 4], strides = [1, 1, 1]} : vector<10x18x4xbf16> to vector<8x16x4xbf16>
    %22 = vector.extract_strided_slice %4 {offsets = [0, 2, 0], sizes = [8, 16, 4], strides = [1, 1, 1]} : vector<10x18x4xbf16> to vector<8x16x4xbf16>
    %23 = vector.extract_strided_slice %4 {offsets = [1, 1, 0], sizes = [8, 16, 4], strides = [1, 1, 1]} : vector<10x18x4xbf16> to vector<8x16x4xbf16>
    %24 = vector.extract_strided_slice %4 {offsets = [1, 2, 0], sizes = [8, 16, 4], strides = [1, 1, 1]} : vector<10x18x4xbf16> to vector<8x16x4xbf16>
    %25 = tpu.concatenate %21, %22, %23, %24 in 2 : vector<8x16x4xbf16>, vector<8x16x4xbf16>, vector<8x16x4xbf16>, vector<8x16x4xbf16> -> vector<8x16x16xbf16>
    %26 = vector.shape_cast %25 : vector<8x16x16xbf16> to vector<128x16xbf16>
    %c1 = arith.constant 1 : index
    %c0_8 = arith.constant 0 : index
    %c0_9 = arith.constant 0 : index
    %27 = vector.load %arg3[%c1, %c0_8, %c0_9] : memref<4x16x8xbf16, #tpu.memory_space<vmem>>, vector<1x16x8xbf16>
    %28 = vector.shape_cast %27 : vector<1x16x8xbf16> to vector<16x8xbf16>
    %cst_10 = arith.constant dense<0.000000e+00> : vector<128x8xf32>
    %29 = tpu.matmul %26, %28, %cst_10 {dimension_numbers = #tpu.dot_dimension_numbers<[1], [0], [0], [1], [0, 0, 1, 1], [], []>} : vector<128x16xbf16>, vector<16x8xbf16>, vector<128x8xf32> -> vector<128x8xf32>
    %30 = arith.addf %29, %7 : vector<128x8xf32>
    %cst_11 = arith.constant 0.000000e+00 : f32
    %31 = vector.broadcast %cst_11 : f32 to vector<128x8xf32>
    %32 = arith.maximumf %30, %31 : vector<128x8xf32>
    %33 = arith.truncf %32 : vector<128x8xf32> to vector<128x8xbf16>
    %34 = vector.extract_strided_slice %4 {offsets = [1, 0, 0], sizes = [8, 16, 4], strides = [1, 1, 1]} : vector<10x18x4xbf16> to vector<8x16x4xbf16>
    %35 = vector.extract_strided_slice %4 {offsets = [1, 1, 0], sizes = [8, 16, 4], strides = [1, 1, 1]} : vector<10x18x4xbf16> to vector<8x16x4xbf16>
    %36 = vector.extract_strided_slice %4 {offsets = [2, 0, 0], sizes = [8, 16, 4], strides = [1, 1, 1]} : vector<10x18x4xbf16> to vector<8x16x4xbf16>
    %37 = vector.extract_strided_slice %4 {offsets = [2, 1, 0], sizes = [8, 16, 4], strides = [1, 1, 1]} : vector<10x18x4xbf16> to vector<8x16x4xbf16>
    %38 = tpu.concatenate %34, %35, %36, %37 in 2 : vector<8x16x4xbf16>, vector<8x16x4xbf16>, vector<8x16x4xbf16>, vector<8x16x4xbf16> -> vector<8x16x16xbf16>
    %39 = vector.shape_cast %38 : vector<8x16x16xbf16> to vector<128x16xbf16>
    %c2 = arith.constant 2 : index
    %c0_12 = arith.constant 0 : index
    %c0_13 = arith.constant 0 : index
    %40 = vector.load %arg3[%c2, %c0_12, %c0_13] : memref<4x16x8xbf16, #tpu.memory_space<vmem>>, vector<1x16x8xbf16>
    %41 = vector.shape_cast %40 : vector<1x16x8xbf16> to vector<16x8xbf16>
    %cst_14 = arith.constant dense<0.000000e+00> : vector<128x8xf32>
    %42 = tpu.matmul %39, %41, %cst_14 {dimension_numbers = #tpu.dot_dimension_numbers<[1], [0], [0], [1], [0, 0, 1, 1], [], []>} : vector<128x16xbf16>, vector<16x8xbf16>, vector<128x8xf32> -> vector<128x8xf32>
    %43 = arith.addf %42, %7 : vector<128x8xf32>
    %cst_15 = arith.constant 0.000000e+00 : f32
    %44 = vector.broadcast %cst_15 : f32 to vector<128x8xf32>
    %45 = arith.maximumf %43, %44 : vector<128x8xf32>
    %46 = arith.truncf %45 : vector<128x8xf32> to vector<128x8xbf16>
    %47 = vector.extract_strided_slice %4 {offsets = [1, 1, 0], sizes = [8, 16, 4], strides = [1, 1, 1]} : vector<10x18x4xbf16> to vector<8x16x4xbf16>
    %48 = vector.extract_strided_slice %4 {offsets = [1, 2, 0], sizes = [8, 16, 4], strides = [1, 1, 1]} : vector<10x18x4xbf16> to vector<8x16x4xbf16>
    %49 = vector.extract_strided_slice %4 {offsets = [2, 1, 0], sizes = [8, 16, 4], strides = [1, 1, 1]} : vector<10x18x4xbf16> to vector<8x16x4xbf16>
    %50 = vector.extract_strided_slice %4 {offsets = [2, 2, 0], sizes = [8, 16, 4], strides = [1, 1, 1]} : vector<10x18x4xbf16> to vector<8x16x4xbf16>
    %51 = tpu.concatenate %47, %48, %49, %50 in 2 : vector<8x16x4xbf16>, vector<8x16x4xbf16>, vector<8x16x4xbf16>, vector<8x16x4xbf16> -> vector<8x16x16xbf16>
    %52 = vector.shape_cast %51 : vector<8x16x16xbf16> to vector<128x16xbf16>
    %c3 = arith.constant 3 : index
    %c0_16 = arith.constant 0 : index
    %c0_17 = arith.constant 0 : index
    %53 = vector.load %arg3[%c3, %c0_16, %c0_17] : memref<4x16x8xbf16, #tpu.memory_space<vmem>>, vector<1x16x8xbf16>
    %54 = vector.shape_cast %53 : vector<1x16x8xbf16> to vector<16x8xbf16>
    %cst_18 = arith.constant dense<0.000000e+00> : vector<128x8xf32>
    %55 = tpu.matmul %52, %54, %cst_18 {dimension_numbers = #tpu.dot_dimension_numbers<[1], [0], [0], [1], [0, 0, 1, 1], [], []>} : vector<128x16xbf16>, vector<16x8xbf16>, vector<128x8xf32> -> vector<128x8xf32>
    %56 = arith.addf %55, %7 : vector<128x8xf32>
    %cst_19 = arith.constant 0.000000e+00 : f32
    %57 = vector.broadcast %cst_19 : f32 to vector<128x8xf32>
    %58 = arith.maximumf %56, %57 : vector<128x8xf32>
    %59 = arith.truncf %58 : vector<128x8xf32> to vector<128x8xbf16>
    %60 = tpu.concatenate %20, %33, %46, %59 in 1 : vector<128x8xbf16>, vector<128x8xbf16>, vector<128x8xbf16>, vector<128x8xbf16> -> vector<128x32xbf16>
    %c0_20 = arith.constant 0 : index
    %c0_21 = arith.constant 0 : index
    %c0_22 = arith.constant 0 : index
    %61 = vector.load %arg5[%c0_20, %c0_21, %c0_22] : memref<1x128x32xbf16, #tpu.memory_space<vmem>>, vector<1x128x32xbf16>
    %62 = vector.shape_cast %61 : vector<1x128x32xbf16> to vector<128x32xbf16>
    %63 = vector.shape_cast %60 : vector<128x32xbf16> to vector<1x128x32xbf16>
    tpu.vector_store %arg5[%c0_20, %c0_21, %c0_22], %63 {strides = array<i32>} : memref<1x128x32xbf16, #tpu.memory_space<vmem>>, vector<1x128x32xbf16>,
    return
  }
  func.func @transform_0(%arg0: i32, %arg1: i32) -> (i32, i32, i32, i32) {
    %c0_i32 = arith.constant 0 : i32
    %c0_i32_0 = arith.constant 0 : i32
    %c0_i32_1 = arith.constant 0 : i32
    %c0_i32_2 = arith.constant 0 : i32
    return %arg0, %c0_i32, %c0_i32_0, %c0_i32_1 : i32, i32, i32, i32
  }
  func.func @transform_1(%arg0: i32, %arg1: i32) -> (i32, i32, i32) {
    %c0_i32 = arith.constant 0 : i32
    %c0_i32_0 = arith.constant 0 : i32
    %c0_i32_1 = arith.constant 0 : i32
    %c0_i32_2 = arith.constant 0 : i32
    return %c0_i32, %c0_i32_0, %c0_i32_1 : i32, i32, i32
  }
  func.func @transform_2(%arg0: i32, %arg1: i32) -> (i32, i32) {
    %c0_i32 = arith.constant 0 : i32
    %c0_i32_0 = arith.constant 0 : i32
    %c0_i32_1 = arith.constant 0 : i32
    return %c0_i32, %c0_i32_0 : i32, i32
  }
  func.func @transform_3(%arg0: i32, %arg1: i32) -> (i32, i32, i32) {
    %c0_i32 = arith.constant 0 : i32
    %c0_i32_0 = arith.constant 0 : i32
    return %arg0, %arg1, %c0_i32 : i32, i32, i32
  }
}

</mosaic_0001>

<bundles_post_ra>
// kernel: tpu_custom_call.1
= control target key start
LH: loop header
LB: loop body
LE: loop exit
PB: predicated region body
PF: predicated region fallthrough
CT: control target
= control target key end

     0   :  { %s1827_s12 = smov 0   ;;  %s1829_s13 = smov 0   ;;  %s2360_s0 = inlined_call_operand.vmem [shape: bf16[2,18,18,4], index: 0, kind: input, shape index: {}]   ;;  %s2361_s1 = inlined_call_operand.vmem [shape: bf16[4,16,8], index: 1, kind: input, shape index: {}]   ;;  %s2362_s2 = inlined_call_operand.vmem [shape: f32[1,8], index: 2, kind: input, shape index: {}]   ;;  %s2363_s3 = inlined_call_operand.vmem [shape: bf16[2,256,32], index: 3, kind: output, shape index: {}]  }
   0x1   :  { %s1831_s14 = smov 0   ;;  %s1833_s15 = smov 0  }
   0x2   :  { %s1835_s16 = smov 0  }
   0x3 LB: > { %s22_s17 = sadd.s32 1, %s1792_s14  ;;  %s25_s18 = sadd.s32 1, %s1796_s15  ;;  %s1800_s16 = sphi %s1835_s16, %s13_s16   ;;  %s1796_s15 = sphi %s1833_s15, %s2368_s15   ;;  %s1792_s14 = sphi %s1831_s14, %s2367_s14   ;;  %s1788_s13 = sphi %s1829_s13, %s2366_s13   ;;  %s1784_s12 = sphi %s1827_s12, %s2365_s12  }
   0x4   : > { %p23_p0 = scmp.ge.s32.totalorder %s22_s17, 2  ;;  %p1596_p1 = scmp.ge.s32.totalorder %s1800_s16, 1 }
   0x5   : > { %p151_p2 = scmp.lt.s32.totalorder %s1800_s16, 5 }
   0x6   : > { %s2370_s17 = smov (%p23_p0, %s22_s17), 0  ;;  %s2372_s18 = smov (!%p23_p0, %s25_s18), %s1796_s15 }
   0x7   : > { %p152_p3 = pnand %p1596_p1, %p151_p2  ;;  %p27_p4 = scmp.ge.s32.totalorder %s2372_s18, 2 }
   0x8   : > { %p179_p5 = scmp.lt.s32.totalorder (!%p152_p3), %s1788_s13, 1  ;;  %s1700_s19 = smul.u32 (!%p152_p3), 96, %s1784_s12 }
   0x9   : > { %s2374_s18 = smov (%p27_p4, %s2372_s18), 0  ;;  %155 = sbr.rel (%p152_p3) target bundleno = 558 (0x22e), region = 32 }
   0xa   : > { %s1802_s25 = smov (!%p152_p3), 8   ;;  %s1803_s26 = smov (!%p152_p3), 4  }
   0xb   : > { %s1804_s27 = smov (!%p152_p3), 12   ;;  %s1805_s11 = smov (!%p152_p3), 16  }
   0xe   : > { %s2376_s13 = smov (!%p179_p5, %s1788_s13), 1  ;;  %vm297_vm0 = vsmask.f32 7424  ;;  %vm462_vm1 = vcmask 31744   ;;  %vm479_vm2 = vcmask 64512   ;;  %vm521_vm3 = vcmask 130048  }
   0xf   : > { %s1715_s20 = smul.u32 216, %s2376_s13  ;;  %vm496_vm4 = vcmask 97280   ;;  %vm1416_vm5 = vcmask 195584   ;;  %vm1489_vm6 = vcmask 257024  }
  0x11   : > { %s183_s23 = scalar_lea.vmem %s2360_s0, %s1715_s20  ;;  %s1598_s20 = sshll.u32 %s1784_s12, 4 }
  0x12   : > { %s1866_s24 = scalar_lea.vmem %s183_s23, %s1700_s19  ;;  %s1806_s19 = smov 24  }
  0x13   : > { %v1869_v0 = vld [vmem:[%s1866_s24 + $0x18] sm:$0xff]  ;;  %v204_v1 = vld [vmem:[%s1866_s24 + $0x14] sm:$0x1]  ;;  %v207_v2 = vld [vmem:[%s1866_s24 + $0x20] sm:$0x1]  ;;  %p2252_p6 = scmp.lt.s32.totalorder %s1598_s20, 31 }
  0x14   : > { %v282_v3 = vunpack.c.l.b16 %v204_v1  ;;  %v283_v4 = vunpack.c.l.b16 %v207_v2  ;;  %v1874_v5 = vld [vmem:[%s1866_s24 + $0xc] sm:$0xff]  ;;  %v201_v6 = vld [vmem:[%s1866_s24 + $0x8] sm:$0x1]  ;;  %v1878_v7 = vld [vmem:[%s1866_s24] sm:$0xff]  ;;  %417 = vrot.lane.b32.xlu0 %v1869_v0, %s1802_s25  ;;  %v325_v22 = vshll.u32 %v1869_v0, 16  ;;  %v323_v28 = vshrl.u32 %v1869_v0, 16 }
  0x15   : > { %v281_v8 = vunpack.c.l.b16 %v201_v6  ;;  %v313_v11 = vshll.u32 %v1874_v5, 16  ;;  %v299_v13 = vshrl.u32 %v1878_v7, 16  ;;  %v301_v14 = vshll.u32 %v1878_v7, 16  ;;  %v210_v34 = vld [vmem:[%s1866_s24 + $0x2c] sm:$0x1]  ;;  %v1914_v37 = vld [vmem:[%s1866_s24 + $0x24] sm:$0xff] }
  0x16   : > { %v1882_v9 = vpack.c.b16 %v282_v3, %v282_v3  ;;  %v1884_v10 = vpack.c.b16 %v283_v4, %v283_v4  ;;  %v311_v18 = vshrl.u32 %v1874_v5, 16  ;;  %v327_v29 = vrot.slane %v325_v22, 1  ;;  %v213_v46 = vld [vmem:[%s1866_s24 + $0x38] sm:$0x1]  ;;  %v1931_v48 = vld [vmem:[%s1866_s24 + $0x30] sm:$0xff]  ;;  %v1950_v60 = vld [vmem:[%s1866_s24 + $0x3c] sm:$0xff] }
  0x17   : > { %v1887_v12 = vpack.c.b16 %v281_v8, %v281_v8  ;;  %v303_v17 = vrot.slane %v301_v14, 1  ;;  %v315_v19 = vrot.slane %v313_v11, 1  ;;  %v284_v38 = vunpack.c.l.b16 %v210_v34  ;;  %v216_v58 = vld [vmem:[%s1866_s24 + $0x44] sm:$0x1]  ;;  %v219_v11 = vld [vmem:[%s1866_s24 + $0x50] sm:$0x1] }
  0x18   : > { %v621_v15 = vshrl.u32 %v1882_v9, 16  ;;  %653 = vrot.lane.b32.xlu2 %v1884_v10, %s1802_s25  ;;  %v623_v16 = vshrl.u32 %v1884_v10, 16  ;;  %v318_v20 = vshll.u32 %v1882_v9, 16  ;;  %v330_v30 = vshll.u32 %v1884_v10, 16  ;;  %v1969_v14 = vld [vmem:[%s1866_s24 + $0x48] sm:$0xff]  ;;  %s2378_s20 = smov (!%p2252_p6, %s1598_s20), 31 }
  0x19   : > { %v306_v21 = vshll.u32 %v1887_v12, 16  ;;  %v304_v23 = vor.u32 %v303_v17, %v299_v13  ;;  %v316_v25 = vor.u32 %v315_v19, %v311_v18  ;;  %v328_v32 = vor.u32 %v327_v29, %v323_v28  ;;  %s1599_s12 = sshll.u32 %s2376_s13, 5 }
  0x1a   : > { %637 = vrot.lane.b32.xlu1 %v621_v15, %s1803_s26  ;;  %v320_v26 = vrot.slane %v318_v20, 1  ;;  %v332_v33 = vrot.slane %v330_v30, 1  ;;  %v619_v36 = vshrl.u32 %v1887_v12, 16  ;;  %v337_v39 = vshll.u32 %v1914_v37, 16  ;;  %s190_s22 = sadd.s32 %s1599_s12, %s2378_s20 }
  0x1b   : > { %v308_v24 = vrot.slane %v306_v21, 1  ;;  %v1919_v40 = vpack.c.b16 %v284_v38, %v284_v38  ;;  %v335_v41 = vshrl.u32 %v1914_v37, 16  ;;  %v285_v49 = vunpack.c.l.b16 %v213_v46  ;;  %s1600_s13 = sshll.u32 %s190_s22, 2 }
  0x1c   : > { %671 = vrot.lane.b32.xlu0 %v623_v16, %s1804_s27  ;;  %v321_v31 = vsel %vm297_vm0, %v316_v25, %v320_v26  ;;  %v333_v35 = vsel %vm297_vm0, %v328_v32, %v332_v33  ;;  %v339_v42 = vrot.slane %v337_v39, 1  ;;  %v349_v50 = vshll.u32 %v1931_v48, 16  ;;  %v1988_v26 = vld [vmem:[%s1866_s24 + $0x54] sm:$0xff]  ;;  %v225_v39 = vld [vmem:[%s1866_s24 + $0x68] sm:$0x1] }
  0x1d   : > { %v309_v27 = vsel %vm297_vm0, %v304_v23, %v308_v24  ;;  %v342_v43 = vshll.u32 %v1919_v40, 16  ;;  %v1937_v51 = vpack.c.b16 %v285_v49, %v285_v49  ;;  %v625_v52 = vshrl.u32 %v1919_v40, 16  ;;  %v222_v24 = vld [vmem:[%s1866_s24 + $0x5c] sm:$0x1] }
  0x1e   : > { %v340_v44 = vor.u32 %v339_v42, %v335_v41  ;;  %v347_v53 = vshrl.u32 %v1931_v48, 16  ;;  %v351_v54 = vrot.slane %v349_v50, 1  ;;  %v286_v61 = vunpack.c.l.b16 %v216_v58  ;;  %v2012_v42 = vld [vmem:[%s1866_s24 + $0x60] sm:$0xff]  ;;  %v228_v58 = vld [vmem:[%s1866_s24 + $0x74] sm:$0x1] }
  0x1f   : > { %v344_v45 = vrot.slane %v342_v43, 1  ;;  %v354_v55 = vshll.u32 %v1937_v51, 16  ;;  %v361_v62 = vshll.u32 %v1950_v60, 16  ;;  %v627_v1 = vshrl.u32 %v1937_v51, 16 }
  0x20   : > { %394 = vrot.lane.b32.xlu2 %v309_v27, %s1803_s26  ;;  %v352_v56 = vor.u32 %v351_v54, %v347_v53  ;;  %v1956_v63 = vpack.c.b16 %v286_v61, %v286_v61  ;;  %v359_v2 = vshrl.u32 %v1950_v60, 16  ;;  %v371_v19 = vshrl.u32 %v1969_v14, 16  ;;  %v1714_v54 = vld [vmem:[%s2361_s1 + $0x18] sm:$0xff] }
  0x21   : > { %v345_v47 = vsel %vm297_vm0, %v340_v44, %v344_v45  ;;  %v356_v57 = vrot.slane %v354_v55, 1  ;;  %v363_v3 = vrot.slane %v361_v62, 1  ;;  %v288_v27 = vunpack.c.l.b16 %v222_v24  ;;  %v1713_v44 = vld [vmem:[%s2361_s1 + $0x10] sm:$0xff]  ;;  %1094 = vmatpush.bf16.msra.mxu3 %v1714_v54  ;;  %v1712_v62 = vld [vmem:[%s2361_s1 + $0x8] sm:$0xff] }
  0x22   : > { %415 = vrot.lane.b32.xlu1 %v1874_v5, %s1802_s25  ;;  %v366_v4 = vshll.u32 %v1956_v63, 16  ;;  %v629_v18 = vshrl.u32 %v1956_v63, 16  ;;  %v385_v28 = vshll.u32 %v1988_v26, 16  ;;  %v432_v43 = vunpack.c.l.b16 %v225_v39  ;;  %977 = vmatpush.bf16.msra.mxu2 %v1713_v44 }
  0x23   : > { %v357_v59 = vsel %vm297_vm0, %v352_v56, %v356_v57  ;;  %v364_v6 = vor.u32 %v363_v3, %v359_v2  ;;  %v1994_v29 = vpack.c.b16 %v288_v27, %v288_v27  ;;  %v437_v46 = vshll.u32 %v2012_v42, 16  ;;  %853 = vmatpush.bf16.msra.mxu1 %v1712_v62 }
  0x24   : > { %396 = vrot.lane.b32.xlu0 %v321_v31, %s1803_s26  ;;  %v368_v8 = vrot.slane %v366_v4, 1  ;;  %v387_v32 = vrot.slane %v385_v28, 1  ;;  %v435_v50 = vshrl.u32 %v2012_v42, 16  ;;  %v937_v2 = vunpack.c.l.b16 %v228_v58 }
  0x25   : > { %v390_v33 = vshll.u32 %v1994_v29, 16  ;;  %v633_v49 = vshrl.u32 %v1994_v29, 16 }
  0x26   : > { %v369_v13 = vsel %vm297_vm0, %v364_v6, %v368_v8  ;;  %v938_v8 = vpack.c.b16 %v937_v2, %v937_v2 }
  0x27   : > { %v392_v38 = vrot.slane %v390_v33, 1 }
  0x28   : > { %446 = vrot.lane.b32.xlu2 %v321_v31, %s1804_s27  ;;  %v383_v31 = vshrl.u32 %v1988_v26, 16 }
  0x2a   : > { %448 = vrot.lane.b32.xlu1 %v333_v35, %s1804_s27 }
  0x2c   : > { %635 = vrot.lane.b32.xlu0 %v619_v36, %s1803_s26  ;;  %v388_v36 = vor.u32 %v387_v32, %v383_v31 }
  0x2e   : > { %v393_v41 = vsel %vm297_vm0, %v388_v36, %v392_v38  ;;  %v1055_v36 = vshrl.u32 %v938_v8, 16 }
  0x30   : > { %669 = vrot.lane.b32.xlu2 %v621_v15, %s1804_s27  ;;  %v287_v15 = vunpack.c.l.b16 %v219_v11 }
  0x32   : > { %651 = vrot.lane.b32.xlu1 %v1882_v9, %s1802_s25  ;;  %v1975_v17 = vpack.c.b16 %v287_v15, %v287_v15 }
  0x34   : > { %398 = vrot.lane.b32.xlu0 %v333_v35, %s1803_s26  ;;  %v378_v21 = vshll.u32 %v1975_v17, 16  ;;  %v631_v30 = vshrl.u32 %v1975_v17, 16  ;;  %v1711_v35 = vld [vmem:[%s2361_s1] sm:$0xff] }
  0x35   : > { %545 = vmatpush.bf16.msra.mxu0 %v1711_v35 }
  0x36   : > { %v380_v23 = vrot.slane %v378_v21, 1 }
  0x38   : > { %450 = vrot.lane.b32.xlu2 %v345_v47, %s1804_s27 }
  0x3a   : > { %419 = vrot.lane.b32.xlu1 %v1914_v37, %s1802_s25 }
  0x3c   : > { %639 = vrot.lane.b32.xlu0 %v623_v16, %s1803_s26  ;;  %v373_v16 = vshll.u32 %v1969_v14, 16 }
  0x3e   : > { %v375_v20 = vrot.slane %v373_v16, 1  ;;  %v947_v16 = vshll.u32 %v938_v8, 16 }
  0x40   : > { %673 = vrot.lane.b32.xlu2 %v625_v52, %s1804_s27  ;;  %v376_v22 = vor.u32 %v375_v20, %v371_v19  ;;  %v949_v20 = vrot.slane %v947_v16, 1 }
  0x42   : > { %655 = vrot.lane.b32.xlu1 %v1919_v40, %s1802_s25  ;;  %v381_v25 = vsel %vm297_vm0, %v376_v22, %v380_v23 }
  0x44   : > { %400 = vrot.lane.b32.xlu0 %v345_v47, %s1803_s26  ;;  %v2021_v47 = vpack.c.b16 %v432_v43, %v432_v43 }
  0x46   : > { %v442_v53 = vshll.u32 %v2021_v47, 16  ;;  %v667_v11 = vshrl.u32 %v2021_v47, 16 }
  0x48   : > { %452 = vrot.lane.b32.xlu2 %v357_v59, %s1804_s27  ;;  %v444_v57 = vrot.slane %v442_v53, 1 }
  0x4a   : > { %421 = vrot.lane.b32.xlu1 %v1931_v48, %s1802_s25 }
  0x4c   : > { %641 = vrot.lane.b32.xlu0 %v625_v52, %s1803_s26  ;;  %v439_v52 = vrot.slane %v437_v46, 1 }
  0x4e   : > { %v440_v56 = vor.u32 %v439_v52, %v435_v50 }
  0x50   : > { %675 = vrot.lane.b32.xlu2 %v627_v1, %s1804_s27  ;;  %v445_v61 = vsel %vm297_vm0, %v440_v56, %v444_v57 }
  0x52   : > { %657 = vrot.lane.b32.xlu1 %v1937_v51, %s1802_s25 }
  0x54   : > { %402 = vrot.lane.b32.xlu0 %v357_v59, %s1803_s26 }
  0x58   : > { %454 = vrot.lane.b32.xlu2 %v369_v13, %s1804_s27 }
  0x5a   : > { %423 = vrot.lane.b32.xlu1 %v1950_v60, %s1802_s25 }
  0x5c   : > { %643 = vrot.lane.b32.xlu0 %v627_v1, %s1803_s26  ;;  %v1710_v1 = vld [vmem:[%s1866_s24 + $0x6c] sm:$0xff] }
  0x5d   : > { %v942_v3 = vshll.u32 %v1710_v1, 16 }
  0x5f   : > { %v944_v15 = vrot.slane %v942_v3, 1 }
  0x60   : > { %677 = vrot.lane.b32.xlu2 %v629_v18, %s1804_s27 }
  0x62   : > { %659 = vrot.lane.b32.xlu1 %v1956_v63, %s1802_s25 }
  0x64   : > { %404 = vrot.lane.b32.xlu0 %v369_v13, %s1803_s26  ;;  %v940_v13 = vshrl.u32 %v1710_v1, 16 }
  0x66   : > { %v945_v19 = vor.u32 %v944_v15, %v940_v13 }
  0x68   : > { %456 = vrot.lane.b32.xlu2 %v381_v25, %s1804_s27  ;;  %v950_v27 = vsel %vm297_vm0, %v945_v19, %v949_v20 }
  0x6a   : > { %425 = vrot.lane.b32.xlu1 %v1969_v14, %s1802_s25 }
  0x6c   : > { %645 = vrot.lane.b32.xlu0 %v629_v18, %s1803_s26 }
  0x70   : > { %679 = vrot.lane.b32.xlu2 %v631_v30, %s1804_s27 }
  0x72   : > { %661 = vrot.lane.b32.xlu1 %v1975_v17, %s1802_s25  ;;  %v2002_v34 = vpop.permute.xlu2 %653 }
  0x74   : > { %406 = vrot.lane.b32.xlu0 %v381_v25, %s1803_s26 }
  0x78   : > { %458 = vrot.lane.b32.xlu2 %v393_v41, %s1804_s27 }
  0x7a   : > { %427 = vrot.lane.b32.xlu1 %v1988_v26, %s1802_s25  ;;  %v395_v45 = vpop.permute.xlu2 %394 }
  0x7b   : > { %v464_v21 = vsel %vm462_vm1, %v1878_v7, %v395_v45 }
  0x7c   : > { %647 = vrot.lane.b32.xlu0 %v631_v30, %s1803_s26 }
  0x80   : > { %681 = vrot.lane.b32.xlu2 %v633_v49, %s1804_s27 }
  0x82   : > { %663 = vrot.lane.b32.xlu1 %v1994_v29, %s1802_s25  ;;  %v447_v55 = vpop.permute.xlu2 %446 }
  0x84   : > { %408 = vrot.lane.b32.xlu0 %v393_v41, %s1803_s26 }
  0x86   : > { %v418_v59 = vpop.permute.xlu0 %417 }
  0x88   : > { %460 = vrot.lane.b32.xlu2 %v445_v61, %s1804_s27 }
  0x8a   : > { %429 = vrot.lane.b32.xlu1 %v2012_v42, %s1802_s25  ;;  %v670_v4 = vpop.permute.xlu2 %669 }
  0x8c   : > { %v638_v6 = vpop.permute.xlu1 %637  ;;  %649 = vrot.lane.b32.xlu0 %v633_v49, %s1803_s26 }
  0x8d   : > { %v688_v24 = vsel %vm462_vm1, %v1882_v9, %v638_v6 }
  0x8e   : > { %v672_v18 = vpop.permute.xlu0 %671  ;;  %v704_v30 = vsel %vm479_vm2, %v688_v24, %v2002_v34 }
  0x8f   : > { %v720_v31 = vsel %vm496_vm4, %v704_v30, %v672_v18 }
  0x90   : > { %683 = vrot.lane.b32.xlu2 %v667_v11, %s1804_s27  ;;  %v749_v39 = vshll.u32 %v720_v31, 16 }
  0x92   : > { %665 = vrot.lane.b32.xlu1 %v2021_v47, %s1802_s25  ;;  %v451_v22 = vpop.permute.xlu2 %450  ;;  %v751_v45 = vrot.slane %v749_v39, 1 }
  0x94   : > { %v416_v23 = vpop.permute.xlu1 %415  ;;  %927 = vrot.lane.b32.xlu0 %v445_v61, %s1803_s26 }
  0x95   : > { %v481_v25 = vsel %vm479_vm2, %v464_v21, %v416_v23 }
  0x96   : > { %v498_v28 = vsel %vm496_vm4, %v481_v25, %v447_v55  ;;  %v397_v7 = vpop.permute.xlu0 %396 }
  0x97   : > { %1644 = vmatmul.msk.bf16.vlgmr.msra.gmra.mxu0 %vm521_vm3, %v498_v28  ;;  %v466_v9 = vsel %vm462_vm1, %v1874_v5, %v397_v7  ;;  %v735_v44 = vshll.u32 %v498_v28, 16  ;;  %v733_v57 = vshrl.u32 %v498_v28, 16 }
  0x98   : > { %951 = vrot.lane.b32.xlu2 %v950_v27, %s1804_s27  ;;  %v483_v35 = vsel %vm479_vm2, %v466_v9, %v418_v59 }
  0x99   : > { %v737_v53 = vrot.slane %v735_v44, 1 }
  0x9a   : > { %934 = vrot.lane.b32.xlu1 %v1710_v1, %s1802_s25  ;;  %v674_v32 = vpop.permute.xlu2 %673 }
  0x9b   : > { %v738_v61 = vor.u32 %v737_v53, %v733_v57 }
  0x9c   : > { %v449_v33 = vpop.permute.xlu1 %448  ;;  %1051 = vrot.lane.b32.xlu0 %v667_v11, %s1803_s26 }
  0x9d   : > { %v500_v38 = vsel %vm496_vm4, %v483_v35, %v449_v33 }
  0x9e   : > { %v745_v34 = vshll.u32 %v500_v38, 16  ;;  %1676 = vmatmul.msk.bf16.vlgmr.msra.gmra.mxu2 %vm521_vm3, %v500_v38  ;;  %v636_v41 = vpop.permute.xlu0 %635  ;;  %v743_v43 = vshrl.u32 %v500_v38, 16 }
  0x9f   : > { %v686_v46 = vsel %vm462_vm1, %v1887_v12, %v636_v41 }
  0xa0   : > { %v747_v5 = vrot.slane %v745_v34, 1  ;;  %1057 = vrot.lane.b32.xlu2 %v1055_v36, %s1804_s27 }
  0xa2   : > { %1053 = vrot.lane.b32.xlu1 %v938_v8, %s1802_s25  ;;  %v748_v49 = vor.u32 %v747_v5, %v743_v43  ;;  %v453_v55 = vpop.permute.xlu2 %452 }
  0xa4   : > { %v652_v50 = vpop.permute.xlu1 %651  ;;  %v752_v52 = vsel %vm297_vm0, %v748_v49, %v751_v45 }
  0xa5   : > { %v702_v54 = vsel %vm479_vm2, %v686_v46, %v652_v50  ;;  %1690 = vmatmul.msk.bf16.vlgmr.msra.gmra.mxu3 %vm521_vm3, %v752_v52 }
  0xa6   : > { %v718_v56 = vsel %vm496_vm4, %v702_v54, %v670_v4  ;;  %v399_v59 = vpop.permute.xlu0 %398 }
  0xa7   : > { %v739_v58 = vshll.u32 %v718_v56, 16  ;;  %1645 = vmatmul.msk.bf16.gmra.mxu0 %vm521_vm3, %v500_v38  ;;  %v468_v12 = vsel %vm462_vm1, %v1869_v0, %v399_v59 }
  0xa9   : > { %v741_v62 = vrot.slane %v739_v58, 1 }
  0xaa   : > { %v676_v11 = vpop.permute.xlu2 %675 }
  0xab   : > { %v742_v1 = vsel %vm297_vm0, %v738_v61, %v741_v62 }
  0xac   : > { %v420_v2 = vpop.permute.xlu1 %419  ;;  %1658 = vmatmul.msk.bf16.vlgmr.msra.gmra.mxu1 %vm521_vm3, %v742_v1 }
  0xad   : > { %v485_v3 = vsel %vm479_vm2, %v468_v12, %v420_v2 }
  0xae   : > { %v502_v6 = vsel %vm496_vm4, %v485_v3, %v451_v22  ;;  %v640_v8 = vpop.permute.xlu0 %639 }
  0xaf   : > { %v755_v4 = vshll.u32 %v502_v6, 16  ;;  %1677 = vmatmul.msk.bf16.gmra.mxu2 %vm521_vm3, %v502_v6  ;;  %v690_v13 = vsel %vm462_vm1, %v1884_v10, %v640_v8  ;;  %v753_v15 = vshrl.u32 %v502_v6, 16 }
  0xb1   : > { %v757_v16 = vrot.slane %v755_v4, 1 }
  0xb2   : > { %v455_v24 = vpop.permute.xlu2 %454 }
  0xb3   : > { %v758_v22 = vor.u32 %v757_v16, %v753_v15 }
  0xb4   : > { %v656_v0 = vpop.permute.xlu1 %655 }
  0xb5   : > { %v706_v18 = vsel %vm479_vm2, %v690_v13, %v656_v0 }
  0xb6   : > { %v722_v19 = vsel %vm496_vm4, %v706_v18, %v674_v32  ;;  %v401_v21 = vpop.permute.xlu0 %400 }
  0xb7   : > { %v759_v20 = vshll.u32 %v722_v19, 16  ;;  %1646 = vmatmul.msk.bf16.gmra.mxu0 %vm521_vm3, %v502_v6  ;;  %v470_v25 = vsel %vm462_vm1, %v1914_v37, %v401_v21 }
  0xb9   : > { %v761_v23 = vrot.slane %v759_v20, 1 }
  0xba   : > { %v678_v33 = vpop.permute.xlu2 %677 }
  0xbb   : > { %v762_v27 = vsel %vm297_vm0, %v758_v22, %v761_v23 }
  0xbc   : > { %v422_v10 = vpop.permute.xlu1 %421  ;;  %1659 = vmatmul.msk.bf16.gmra.mxu1 %vm521_vm3, %v752_v52  ;;  %1691 = vmatmul.msk.bf16.gmra.mxu3 %vm521_vm3, %v762_v27 }
  0xbd   : > { %v487_v28 = vsel %vm479_vm2, %v470_v25, %v422_v10 }
  0xbe   : > { %v504_v7 = vsel %vm496_vm4, %v487_v28, %v453_v55  ;;  %v642_v9 = vpop.permute.xlu0 %641 }
  0xbf   : > { %v765_v30 = vshll.u32 %v504_v7, 16  ;;  %1678 = vmatmul.msk.bf16.gmra.mxu2 %vm521_vm3, %v504_v7  ;;  %v692_v31 = vsel %vm462_vm1, %v1919_v40, %v642_v9  ;;  %v763_v32 = vshrl.u32 %v504_v7, 16 }
  0xc1   : > { %v767_v37 = vrot.slane %v765_v30, 1 }
  0xc2   : > { %v457_v46 = vpop.permute.xlu2 %456 }
  0xc3   : > { %v768_v41 = vor.u32 %v767_v37, %v763_v32 }
  0xc4   : > { %v658_v35 = vpop.permute.xlu1 %657 }
  0xc5   : > { %v708_v36 = vsel %vm479_vm2, %v692_v31, %v658_v35 }
  0xc6   : > { %v724_v38 = vsel %vm496_vm4, %v708_v36, %v676_v11  ;;  %v403_v34 = vpop.permute.xlu0 %402 }
  0xc7   : > { %v769_v39 = vshll.u32 %v724_v38, 16  ;;  %1647 = vmatmul.msk.bf16.gmra.mxu0 %vm521_vm3, %v504_v7  ;;  %v472_v5 = vsel %vm462_vm1, %v1931_v48, %v403_v34 }
  0xc9   : > { %v771_v43 = vrot.slane %v769_v39, 1 }
  0xca   : > { %v680_v62 = vpop.permute.xlu2 %679 }
  0xcb   : > { %v772_v44 = vsel %vm297_vm0, %v768_v41, %v771_v43 }
  0xcc   : > { %v424_v40 = vpop.permute.xlu1 %423  ;;  %1660 = vmatmul.msk.bf16.gmra.mxu1 %vm521_vm3, %v762_v27  ;;  %1692 = vmatmul.msk.bf16.gmra.mxu3 %vm521_vm3, %v772_v44 }
  0xcd   : > { %v489_v45 = vsel %vm479_vm2, %v472_v5, %v424_v40 }
  0xce   : > { %v506_v49 = vsel %vm496_vm4, %v489_v45, %v455_v24  ;;  %v644_v52 = vpop.permute.xlu0 %643 }
  0xcf   : > { %v775_v50 = vshll.u32 %v506_v49, 16  ;;  %1679 = vmatmul.msk.bf16.gmra.mxu2 %vm521_vm3, %v506_v49  ;;  %v694_v53 = vsel %vm462_vm1, %v1937_v51, %v644_v52  ;;  %v773_v48 = vshrl.u32 %v506_v49, 16 }
  0xd1   : > { %v777_v54 = vrot.slane %v775_v50, 1 }
  0xd2   : > { %v459_v11 = vpop.permute.xlu2 %458 }
  0xd3   : > { %v778_v61 = vor.u32 %v777_v54, %v773_v48 }
  0xd4   : > { %v660_v55 = vpop.permute.xlu1 %659 }
  0xd5   : > { %v710_v56 = vsel %vm479_vm2, %v694_v53, %v660_v55 }
  0xd6   : > { %v726_v57 = vsel %vm496_vm4, %v710_v56, %v678_v33  ;;  %v405_v59 = vpop.permute.xlu0 %404 }
  0xd7   : > { %v779_v58 = vshll.u32 %v726_v57, 16  ;;  %1648 = vmatmul.msk.bf16.gmra.mxu0 %vm521_vm3, %v506_v49  ;;  %v474_v1 = vsel %vm462_vm1, %v1950_v60, %v405_v59 }
  0xd9   : > { %v781_v12 = vrot.slane %v779_v58, 1 }
  0xda   : > { %v682_v25 = vpop.permute.xlu2 %681 }
  0xdb   : > { %v782_v2 = vsel %vm297_vm0, %v778_v61, %v781_v12 }
  0xdc   : > { %v426_v51 = vpop.permute.xlu1 %425  ;;  %1661 = vmatmul.msk.bf16.gmra.mxu1 %vm521_vm3, %v772_v44  ;;  %1693 = vmatmul.msk.bf16.gmra.mxu3 %vm521_vm3, %v782_v2 }
  0xdd   : > { %v491_v3 = vsel %vm479_vm2, %v474_v1, %v426_v51 }
  0xde   : > { %v508_v6 = vsel %vm496_vm4, %v491_v3, %v457_v46  ;;  %v646_v8 = vpop.permute.xlu0 %645 }
  0xdf   : > { %v785_v4 = vshll.u32 %v508_v6, 16  ;;  %1680 = vmatmul.msk.bf16.gmra.mxu2 %vm521_vm3, %v508_v6  ;;  %v696_v13 = vsel %vm462_vm1, %v1956_v63, %v646_v8  ;;  %v783_v60 = vshrl.u32 %v508_v6, 16 }
  0xe1   : > { %v787_v15 = vrot.slane %v785_v4, 1 }
  0xe2   : > { %v461_v37 = vpop.permute.xlu2 %460 }
  0xe3   : > { %v788_v21 = vor.u32 %v787_v15, %v783_v60 }
  0xe4   : > { %v662_v16 = vpop.permute.xlu1 %661 }
  0xe5   : > { %v712_v0 = vsel %vm479_vm2, %v696_v13, %v662_v16 }
  0xe6   : > { %v728_v18 = vsel %vm496_vm4, %v712_v0, %v680_v62  ;;  %v407_v20 = vpop.permute.xlu0 %406 }
  0xe7   : > { %v789_v19 = vshll.u32 %v728_v18, 16  ;;  %1649 = vmatmul.msk.bf16.gmra.mxu0 %vm521_vm3, %v508_v6  ;;  %v476_v23 = vsel %vm462_vm1, %v1969_v14, %v407_v20 }
  0xe9   : > { %v791_v22 = vrot.slane %v789_v19, 1 }
  0xea   : > { %v684_v45 = vpop.permute.xlu2 %683 }
  0xeb   : > { %v792_v24 = vsel %vm297_vm0, %v788_v21, %v791_v22 }
  0xec   : > { %v428_v63 = vpop.permute.xlu1 %427  ;;  %1662 = vmatmul.msk.bf16.gmra.mxu1 %vm521_vm3, %v782_v2  ;;  %1694 = vmatmul.msk.bf16.gmra.mxu3 %vm521_vm3, %v792_v24 }
  0xed   : > { %v493_v27 = vsel %vm479_vm2, %v476_v23, %v428_v63 }
  0xee   : > { %v510_v10 = vsel %vm496_vm4, %v493_v27, %v459_v11  ;;  %v648_v7 = vpop.permute.xlu0 %647 }
  0xef   : > { %v795_v28 = vshll.u32 %v510_v10, 16  ;;  %1681 = vmatmul.msk.bf16.gmra.mxu2 %vm521_vm3, %v510_v10  ;;  %v698_v30 = vsel %vm462_vm1, %v1975_v17, %v648_v7  ;;  %v793_v14 = vshrl.u32 %v510_v10, 16 }
  0xf1   : > { %v797_v9 = vrot.slane %v795_v28, 1 }
  0xf2   : > { %v952_v57 = vpop.permute.xlu2 %951 }
  0xf3   : > { %v798_v38 = vor.u32 %v797_v9, %v793_v14 }
  0xf4   : > { %v664_v31 = vpop.permute.xlu1 %663 }
  0xf5   : > { %v714_v32 = vsel %vm479_vm2, %v698_v30, %v664_v31 }
  0xf6   : > { %v730_v33 = vsel %vm496_vm4, %v714_v32, %v682_v25  ;;  %v409_v36 = vpop.permute.xlu0 %408 }
  0xf7   : > { %v799_v35 = vshll.u32 %v730_v33, 16  ;;  %1650 = vmatmul.msk.bf16.gmra.mxu0 %vm521_vm3, %v510_v10  ;;  %v478_v34 = vsel %vm462_vm1, %v1988_v26, %v409_v36 }
  0xf9   : > { %v801_v39 = vrot.slane %v799_v35, 1 }
  0xfa   : > { %v1058_v3 = vpop.permute.xlu2 %1057 }
  0xfb   : > { %v802_v41 = vsel %vm297_vm0, %v798_v38, %v801_v39 }
  0xfc   : > { %v430_v17 = vpop.permute.xlu1 %429  ;;  %1663 = vmatmul.msk.bf16.gmra.mxu1 %vm521_vm3, %v792_v24  ;;  %1695 = vmatmul.msk.bf16.gmra.mxu3 %vm521_vm3, %v802_v41 }
  0xfd   : > { %v495_v43 = vsel %vm479_vm2, %v478_v34, %v430_v17 }
  0xfe   : > { %v512_v5 = vsel %vm496_vm4, %v495_v43, %v461_v37  ;;  %v650_v40 = vpop.permute.xlu0 %649 }
  0xff   : > { %v805_v44 = vshll.u32 %v512_v5, 16  ;;  %1682 = vmatmul.msk.bf16.gmra.mxu2 %vm521_vm3, %v512_v5  ;;  %v700_v46 = vsel %vm462_vm1, %v1994_v29, %v650_v40  ;;  %v803_v26 = vshrl.u32 %v512_v5, 16 }
 0x101   : > { %v807_v49 = vrot.slane %v805_v44, 1 }
 0x103   : > { %v808_v55 = vor.u32 %v807_v49, %v803_v26 }
 0x104   : > { %v666_v50 = vpop.permute.xlu1 %665 }
 0x105   : > { %v716_v52 = vsel %vm479_vm2, %v700_v46, %v666_v50 }
 0x106   : > { %v732_v53 = vsel %vm496_vm4, %v716_v52, %v684_v45  ;;  %v928_v54 = vpop.permute.xlu0 %927 }
 0x107   : > { %v809_v48 = vshll.u32 %v732_v53, 16  ;;  %1651 = vmatmul.msk.bf16.gmra.mxu0 %vm521_vm3, %v512_v5  ;;  %v954_v58 = vsel %vm462_vm1, %v2012_v42, %v928_v54 }
 0x109   : > { %v811_v56 = vrot.slane %v809_v48, 1 }
 0x10b   : > { %v812_v59 = vsel %vm297_vm0, %v808_v55, %v811_v56 }
 0x10c   : > { %v935_v29 = vpop.permute.xlu1 %934  ;;  %1664 = vmatmul.msk.bf16.gmra.mxu1 %vm521_vm3, %v802_v41  ;;  %1696 = vmatmul.msk.bf16.gmra.mxu3 %vm521_vm3, %v812_v59 }
 0x10d   : > { %v956_v61 = vsel %vm479_vm2, %v954_v58, %v935_v29 }
 0x10e   : > { %v958_v62 = vsel %vm496_vm4, %v956_v61, %v952_v57  ;;  %v1052_v1 = vpop.permute.xlu0 %1051 }
 0x10f   : > { %1683 = vmatmul.msk.bf16.gmra.mxu2 %vm521_vm3, %v958_v62  ;;  %v1067_v12 = vshll.u32 %v958_v62, 16  ;;  %v1060_v2 = vsel %vm462_vm1, %v2021_v47, %v1052_v1  ;;  %v1065_v51 = vshrl.u32 %v958_v62, 16  ;;  %v2171_v47 = vld [vmem:[%s2362_s2] ss:$0 sm:$0xff] }
 0x111   : > { %v1069_v42 = vrot.slane %v1067_v12, 1 }
 0x113   : > { %v1070_v11 = vor.u32 %v1069_v42, %v1065_v51 }
 0x114   : > { %v1054_v6 = vpop.permute.xlu1 %1053 }
 0x115   : > { %v1062_v4 = vsel %vm479_vm2, %v1060_v2, %v1054_v6 }
 0x116   : > { %v1064_v8 = vsel %vm496_vm4, %v1062_v4, %v1058_v3 }
 0x117   : > { %v1071_v13 = vshll.u32 %v1064_v8, 16 }
 0x119   : > { %v1073_v60 = vrot.slane %v1071_v13, 1 }
 0x11b   : > { %v1074_v15 = vsel %vm297_vm0, %v1070_v11, %v1073_v60 }
 0x11c   : > { %1665 = vmatmul.msk.bf16.gmra.mxu1 %vm521_vm3, %v812_v59  ;;  %1697 = vmatmul.msk.bf16.gmra.mxu3 %vm521_vm3, %v1074_v15 }
 0x121   : > { %v979_v16 = vpop.f32.mrf.mxu2 }
 0x122   : > { %v980_v0 = vadd.f32 %v2171_v47, %v979_v16 }
 0x124   : > { %v1019_v18 = vmax.f32 %v980_v0, 0.0 }
 0x126   : > { %v1035_v24 = vpack.c.bf16 %v1019_v18, %v1019_v18 }
 0x128   : > { %v1096_v19 = vpop.f32.mrf.mxu3  ;;  %v1280_v28 = vunpack.c.l.b16 %v1035_v24 }
 0x129   : > { %v855_v20 = vpop.f32.mrf.mxu1  ;;  %v981_v21 = vpop.f32.mrf.mxu2  ;;  %v1097_v23 = vadd.f32 %v2171_v47, %v1096_v19 }
 0x12a   : > { %v982_v22 = vadd.f32 %v2171_v47, %v981_v21  ;;  %v856_v25 = vadd.f32 %v2171_v47, %v855_v20 }
 0x12b   : > { %v1136_v10 = vmax.f32 %v1097_v23, 0.0 }
 0x12c   : > { %v1020_v63 = vmax.f32 %v982_v22, 0.0  ;;  %v895_v7 = vmax.f32 %v856_v25, 0.0 }
 0x12d   : > { %v1152_v35 = vpack.c.bf16 %v1136_v10, %v1136_v10 }
 0x12e   : > { %v1036_v27 = vpack.c.bf16 %v1020_v63, %v1020_v63  ;;  %v911_v39 = vpack.c.bf16 %v895_v7, %v895_v7 }
 0x12f   : > { %v1336_v43 = vunpack.c.l.b16 %v1152_v35 }
 0x130   : > { %v1281_v30 = vunpack.c.l.b16 %v1036_v27  ;;  %v1098_v14 = vpop.f32.mrf.mxu3  ;;  %v1224_v40 = vunpack.c.l.b16 %v911_v39 }
 0x131   : > { %v1099_v9 = vadd.f32 %v2171_v47, %v1098_v14  ;;  %v857_v31 = vpop.f32.mrf.mxu1 }
 0x132   : > { %v858_v32 = vadd.f32 %v2171_v47, %v857_v31  ;;  %v984_v37 = vpop.f32.mrf.mxu2  ;;  %v1296_v33 = vpack.c.b16 %v1281_v30, %v1280_v28 }
 0x133   : > { %v1137_v36 = vmax.f32 %v1099_v9, 0.0  ;;  %v985_v38 = vadd.f32 %v2171_v47, %v984_v37 }
 0x134   : > { %v896_v34 = vmax.f32 %v858_v32, 0.0  ;;  %1304 = vrot.lane.b32.xlu2 %v1296_v33, %s1805_s11 }
 0x135   : > { %v1153_v41 = vpack.c.bf16 %v1137_v36, %v1137_v36  ;;  %v1021_v44 = vmax.f32 %v985_v38, 0.0 }
 0x136   : > { %v912_v17 = vpack.c.bf16 %v896_v34, %v896_v34 }
 0x137   : > { %v1337_v5 = vunpack.c.l.b16 %v1153_v41  ;;  %v1037_v52 = vpack.c.bf16 %v1021_v44, %v1021_v44 }
 0x138   : > { %v1225_v45 = vunpack.c.l.b16 %v912_v17 }
 0x139   : > { %v860_v46 = vpop.f32.mrf.mxu1  ;;  %v1352_v26 = vpack.c.b16 %v1337_v5, %v1336_v43  ;;  %v1282_v55 = vunpack.c.l.b16 %v1037_v52 }
 0x13a   : > { %v986_v49 = vpop.f32.mrf.mxu2  ;;  %v1240_v50 = vpack.c.b16 %v1225_v45, %v1224_v40  ;;  %v861_v48 = vadd.f32 %v2171_v47, %v860_v46 }
 0x13b   : > { %v987_v53 = vadd.f32 %v2171_v47, %v986_v49  ;;  %1360 = vrot.lane.b32.xlu1 %v1352_v26, %s1806_s19 }
 0x13c   : > { %1248 = vrot.lane.b32.xlu0 %v1240_v50, %s1802_s25  ;;  %v897_v58 = vmax.f32 %v861_v48, 0.0 }
 0x13d   : > { %v1022_v54 = vmax.f32 %v987_v53, 0.0 }
 0x13e   : > { %v913_v51 = vpack.c.bf16 %v897_v58, %v897_v58 }
 0x13f   : > { %v1038_v56 = vpack.c.bf16 %v1022_v54, %v1022_v54  ;;  %v1101_v57 = vpop.f32.mrf.mxu3 }
 0x140   : > { %v1102_v61 = vadd.f32 %v2171_v47, %v1101_v57  ;;  %v1226_v11 = vunpack.c.l.b16 %v913_v51 }
 0x141   : > { %v1283_v59 = vunpack.c.l.b16 %v1038_v56  ;;  %v862_v29 = vpop.f32.mrf.mxu1 }
 0x142   : > { %v863_v62 = vadd.f32 %v2171_v47, %v862_v29  ;;  %v989_v12 = vpop.f32.mrf.mxu2  ;;  %v1138_v3 = vmax.f32 %v1102_v61, 0.0 }
 0x143   : > { %v990_v1 = vadd.f32 %v2171_v47, %v989_v12  ;;  %v1297_v2 = vpack.c.b16 %v1283_v59, %v1282_v55 }
 0x144   : > { %v898_v42 = vmax.f32 %v863_v62, 0.0  ;;  %v1154_v16 = vpack.c.bf16 %v1138_v3, %v1138_v3 }
 0x145   : > { %1306 = vrot.lane.b32.xlu0 %v1297_v2, %s1805_s11  ;;  %v1023_v4 = vmax.f32 %v990_v1, 0.0 }
 0x146   : > { %v914_v6 = vpack.c.bf16 %v898_v42, %v898_v42  ;;  %v1338_v25 = vunpack.c.l.b16 %v1154_v16 }
 0x147   : > { %v1103_v8 = vpop.f32.mrf.mxu3  ;;  %v1039_v20 = vpack.c.bf16 %v1023_v4, %v1023_v4 }
 0x148   : > { %v1227_v13 = vunpack.c.l.b16 %v914_v6  ;;  %v1104_v60 = vadd.f32 %v2171_v47, %v1103_v8 }
 0x149   : > { %v865_v15 = vpop.f32.mrf.mxu1  ;;  %v1284_v27 = vunpack.c.l.b16 %v1039_v20 }
 0x14a   : > { %v1139_v0 = vmax.f32 %v1104_v60, 0.0  ;;  %v991_v18 = vpop.f32.mrf.mxu2  ;;  %v1241_v19 = vpack.c.b16 %v1227_v13, %v1226_v11  ;;  %v866_v23 = vadd.f32 %v2171_v47, %v865_v15 }
 0x14b   : > { %v992_v21 = vadd.f32 %v2171_v47, %v991_v18 }
 0x14c   : > { %v1155_v22 = vpack.c.bf16 %v1139_v0, %v1139_v0  ;;  %1250 = vrot.lane.b32.xlu1 %v1241_v19, %s1802_s25  ;;  %v899_v7 = vmax.f32 %v866_v23, 0.0 }
 0x14d   : > { %v1024_v24 = vmax.f32 %v992_v21, 0.0 }
 0x14e   : > { %v1339_v63 = vunpack.c.l.b16 %v1155_v22  ;;  %v915_v36 = vpack.c.bf16 %v899_v7, %v899_v7 }
 0x14f   : > { %v1040_v10 = vpack.c.bf16 %v1024_v24, %v1024_v24  ;;  %v1106_v28 = vpop.f32.mrf.mxu3 }
 0x150   : > { %v1353_v30 = vpack.c.b16 %v1339_v63, %v1338_v25  ;;  %v1107_v31 = vadd.f32 %v2171_v47, %v1106_v28  ;;  %v1228_v43 = vunpack.c.l.b16 %v915_v36 }
 0x151   : > { %v1285_v14 = vunpack.c.l.b16 %v1040_v10  ;;  %v867_v9 = vpop.f32.mrf.mxu1 }
 0x152   : > { %v868_v32 = vadd.f32 %v2171_v47, %v867_v9  ;;  %1362 = vrot.lane.b32.xlu2 %v1353_v30, %s1806_s19  ;;  %v994_v37 = vpop.f32.mrf.mxu2  ;;  %v1140_v39 = vmax.f32 %v1107_v31, 0.0 }
 0x153   : > { %v995_v33 = vadd.f32 %v2171_v47, %v994_v37  ;;  %v1298_v35 = vpack.c.b16 %v1285_v14, %v1284_v27 }
 0x154   : > { %v900_v38 = vmax.f32 %v868_v32, 0.0  ;;  %v1156_v45 = vpack.c.bf16 %v1140_v39, %v1140_v39 }
 0x155   : > { %1308 = vrot.lane.b32.xlu1 %v1298_v35, %s1805_s11  ;;  %v1025_v41 = vmax.f32 %v995_v33, 0.0 }
 0x156   : > { %v916_v34 = vpack.c.bf16 %v900_v38, %v900_v38  ;;  %v1340_v55 = vunpack.c.l.b16 %v1156_v45 }
 0x157   : > { %v1108_v17 = vpop.f32.mrf.mxu3  ;;  %v1041_v50 = vpack.c.bf16 %v1025_v41, %v1025_v41 }
 0x158   : > { %v1229_v5 = vunpack.c.l.b16 %v916_v34  ;;  %v1109_v44 = vadd.f32 %v2171_v47, %v1108_v17  ;;  %v2215_v34 = vpop.f32.mrf.mxu0 }
 0x159   : > { %v870_v40 = vpop.f32.mrf.mxu1  ;;  %v1286_v57 = vunpack.c.l.b16 %v1041_v50 }
 0x15a   : > { %v1141_v46 = vmax.f32 %v1109_v44, 0.0  ;;  %v996_v26 = vpop.f32.mrf.mxu2  ;;  %v1242_v49 = vpack.c.b16 %v1229_v5, %v1228_v43  ;;  %v871_v48 = vadd.f32 %v2171_v47, %v870_v40 }
 0x15b   : > { %v997_v52 = vadd.f32 %v2171_v47, %v996_v26 }
 0x15c   : > { %v1157_v53 = vpack.c.bf16 %v1141_v46, %v1141_v46  ;;  %1252 = vrot.lane.b32.xlu2 %v1242_v49, %s1802_s25  ;;  %v901_v29 = vmax.f32 %v871_v48, 0.0 }
 0x15d   : > { %v1026_v54 = vmax.f32 %v997_v52, 0.0 }
 0x15e   : > { %v1341_v56 = vunpack.c.l.b16 %v1157_v53  ;;  %v917_v6 = vpack.c.bf16 %v901_v29, %v901_v29 }
 0x15f   : > { %v1042_v58 = vpack.c.bf16 %v1026_v54, %v1026_v54  ;;  %v1111_v59 = vpop.f32.mrf.mxu3 }
 0x160   : > { %v1354_v61 = vpack.c.b16 %v1341_v56, %v1340_v55  ;;  %v1112_v1 = vadd.f32 %v2171_v47, %v1111_v59  ;;  %v1230_v15 = vunpack.c.l.b16 %v917_v6  ;;  %v549_v59 = vpop.f32.mrf.mxu0 }
 0x161   : > { %v1287_v62 = vunpack.c.l.b16 %v1042_v58  ;;  %v872_v12 = vpop.f32.mrf.mxu1 }
 0x162   : > { %v873_v2 = vadd.f32 %v2171_v47, %v872_v12  ;;  %1364 = vrot.lane.b32.xlu0 %v1354_v61, %s1806_s19  ;;  %v999_v51 = vpop.f32.mrf.mxu2  ;;  %v1142_v8 = vmax.f32 %v1112_v1, 0.0 }
 0x163   : > { %v1000_v42 = vadd.f32 %v2171_v47, %v999_v51  ;;  %v1299_v3 = vpack.c.b16 %v1287_v62, %v1286_v57 }
 0x164   : > { %v902_v4 = vmax.f32 %v873_v2, 0.0  ;;  %v1158_v19 = vpack.c.bf16 %v1142_v8, %v1142_v8 }
 0x165   : > { %1310 = vrot.lane.b32.xlu2 %v1299_v3, %s1805_s11  ;;  %v1027_v13 = vmax.f32 %v1000_v42, 0.0 }
 0x166   : > { %v918_v11 = vpack.c.bf16 %v902_v4, %v902_v4  ;;  %v1342_v10 = vunpack.c.l.b16 %v1158_v19 }
 0x167   : > { %v1113_v60 = vpop.f32.mrf.mxu3  ;;  %v1043_v23 = vpack.c.bf16 %v1027_v13, %v1027_v13 }
 0x168   : > { %v1231_v16 = vunpack.c.l.b16 %v918_v11  ;;  %v1114_v0 = vadd.f32 %v2171_v47, %v1113_v60 }
 0x169   : > { %v875_v18 = vpop.f32.mrf.mxu1  ;;  %v1288_v7 = vunpack.c.l.b16 %v1043_v23 }
 0x16a   : > { %v1143_v20 = vmax.f32 %v1114_v0, 0.0  ;;  %v1001_v21 = vpop.f32.mrf.mxu2  ;;  %v1243_v22 = vpack.c.b16 %v1231_v16, %v1230_v15  ;;  %v876_v63 = vadd.f32 %v2171_v47, %v875_v18  ;;  %v2226_v18 = vpop.f32.mrf.mxu0 }
 0x16b   : > { %v1002_v24 = vadd.f32 %v2171_v47, %v1001_v21 }
 0x16c   : > { %v1159_v25 = vpack.c.bf16 %v1143_v20, %v1143_v20  ;;  %1254 = vrot.lane.b32.xlu0 %v1243_v22, %s1802_s25  ;;  %v903_v9 = vmax.f32 %v876_v63, 0.0 }
 0x16d   : > { %v1028_v27 = vmax.f32 %v1002_v24, 0.0 }
 0x16e   : > { %v1343_v28 = vunpack.c.l.b16 %v1159_v25  ;;  %v919_v41 = vpack.c.bf16 %v903_v9, %v903_v9 }
 0x16f   : > { %v1044_v30 = vpack.c.bf16 %v1028_v27, %v1028_v27  ;;  %v1116_v14 = vpop.f32.mrf.mxu3 }
 0x170   : > { %v1355_v31 = vpack.c.b16 %v1343_v28, %v1342_v10  ;;  %v1117_v33 = vadd.f32 %v2171_v47, %v1116_v14  ;;  %v1232_v45 = vunpack.c.l.b16 %v919_v41 }
 0x171   : > { %v1289_v32 = vunpack.c.l.b16 %v1044_v30  ;;  %v877_v37 = vpop.f32.mrf.mxu1 }
 0x172   : > { %v878_v35 = vadd.f32 %v2171_v47, %v877_v37  ;;  %1366 = vrot.lane.b32.xlu1 %v1355_v31, %s1806_s19  ;;  %v1004_v36 = vpop.f32.mrf.mxu2  ;;  %v1144_v43 = vmax.f32 %v1117_v33, 0.0  ;;  %v2231_v31 = vpop.f32.mrf.mxu0 }
 0x173   : > { %v1005_v38 = vadd.f32 %v2171_v47, %v1004_v36  ;;  %v1300_v39 = vpack.c.b16 %v1289_v32, %v1288_v7 }
 0x174   : > { %v904_v17 = vmax.f32 %v878_v35, 0.0  ;;  %v1160_v50 = vpack.c.bf16 %v1144_v43, %v1144_v43 }
 0x175   : > { %1312 = vrot.lane.b32.xlu0 %v1300_v39, %s1805_s11  ;;  %v1029_v44 = vmax.f32 %v1005_v38, 0.0 }
 0x176   : > { %v920_v5 = vpack.c.bf16 %v904_v17, %v904_v17  ;;  %v1344_v29 = vunpack.c.l.b16 %v1160_v50 }
 0x177   : > { %v1118_v40 = vpop.f32.mrf.mxu3  ;;  %v1045_v54 = vpack.c.bf16 %v1029_v44, %v1029_v44 }
 0x178   : > { %v1233_v46 = vunpack.c.l.b16 %v920_v5  ;;  %v1119_v26 = vadd.f32 %v2171_v47, %v1118_v40 }
 0x179   : > { %v880_v49 = vpop.f32.mrf.mxu1  ;;  %v1290_v62 = vunpack.c.l.b16 %v1045_v54 }
 0x17a   : > { %v1145_v52 = vmax.f32 %v1119_v26, 0.0  ;;  %v1006_v53 = vpop.f32.mrf.mxu2  ;;  %v1244_v48 = vpack.c.b16 %v1233_v46, %v1232_v45  ;;  %v881_v57 = vadd.f32 %v2171_v47, %v880_v49  ;;  %v2238_v50 = vpop.f32.mrf.mxu0 }
 0x17b   : > { %v1007_v55 = vadd.f32 %v2171_v47, %v1006_v53  ;;  %v550_v53 = vadd.f32 %v2171_v47, %v549_v59 }
 0x17c   : > { %v1161_v56 = vpack.c.bf16 %v1145_v52, %v1145_v52  ;;  %1256 = vrot.lane.b32.xlu1 %v1244_v48, %s1802_s25  ;;  %v905_v2 = vmax.f32 %v881_v57, 0.0 }
 0x17d   : > { %v1030_v58 = vmax.f32 %v1007_v55, 0.0  ;;  %v548_v55 = vadd.f32 %v2171_v47, %v2215_v34 }
 0x17e   : > { %v1345_v61 = vunpack.c.l.b16 %v1161_v56  ;;  %v921_v13 = vpack.c.bf16 %v905_v2, %v905_v2 }
 0x17f   : > { %v1046_v12 = vpack.c.bf16 %v1030_v58, %v1030_v58  ;;  %v1121_v1 = vpop.f32.mrf.mxu3 }
 0x180   : > { %v1356_v51 = vpack.c.b16 %v1345_v61, %v1344_v29  ;;  %v1234_v19 = vunpack.c.l.b16 %v921_v13  ;;  %v1122_v48 = vadd.f32 %v2171_v47, %v1121_v1  ;;  %v587_v1 = vmax.f32 %v548_v55, 0.0 }
 0x181   : > { %v1291_v42 = vunpack.c.l.b16 %v1046_v12  ;;  %v882_v3 = vpop.f32.mrf.mxu1 }
 0x182   : > { %v883_v6 = vadd.f32 %v2171_v47, %v882_v3  ;;  %1368 = vrot.lane.b32.xlu2 %v1356_v51, %s1806_s19  ;;  %v1009_v4 = vpop.f32.mrf.mxu2  ;;  %v1146_v12 = vmax.f32 %v1122_v48, 0.0 }
 0x183   : > { %v1010_v8 = vadd.f32 %v2171_v47, %v1009_v4  ;;  %v1301_v11 = vpack.c.b16 %v1291_v42, %v1290_v62  ;;  %v588_v62 = vmax.f32 %v550_v53, 0.0 }
 0x184   : > { %v906_v60 = vmax.f32 %v883_v6, 0.0 }
 0x185   : > { %1314 = vrot.lane.b32.xlu1 %v1301_v11, %s1805_s11  ;;  %v1031_v16 = vmax.f32 %v1010_v8, 0.0  ;;  %v604_v13 = vpack.c.bf16 %v588_v62, %v588_v62 }
 0x186   : > { %v922_v15 = vpack.c.bf16 %v906_v60, %v906_v60  ;;  %v1162_v60 = vpack.c.bf16 %v1146_v12, %v1146_v12 }
 0x187   : > { %v1123_v0 = vpop.f32.mrf.mxu3  ;;  %v1047_v24 = vpack.c.bf16 %v1031_v16, %v1031_v16 }
 0x188   : > { %v1235_v20 = vunpack.c.l.b16 %v922_v15  ;;  %v1124_v46 = vadd.f32 %v2171_v47, %v1123_v0  ;;  %v2256_v15 = vpop.f32.mrf.mxu0 }
 0x189   : > { %v885_v21 = vpop.f32.mrf.mxu1  ;;  %v1292_v10 = vunpack.c.l.b16 %v1047_v24 }
 0x18a   : > { %v1011_v22 = vpop.f32.mrf.mxu2  ;;  %v1245_v23 = vpack.c.b16 %v1235_v20, %v1234_v19  ;;  %v886_v63 = vadd.f32 %v2171_v47, %v885_v21  ;;  %v1147_v56 = vmax.f32 %v1124_v46, 0.0  ;;  %v603_v20 = vpack.c.bf16 %v587_v1, %v587_v1 }
 0x18b   : > { %v1012_v25 = vadd.f32 %v2171_v47, %v1011_v22  ;;  %v560_v1 = vadd.f32 %v2171_v47, %v2256_v15 }
 0x18c   : > { %1258 = vrot.lane.b32.xlu2 %v1245_v23, %s1802_s25  ;;  %v907_v30 = vmax.f32 %v886_v63, 0.0  ;;  %v1163_v6 = vpack.c.bf16 %v1147_v56, %v1147_v56 }
 0x18d   : > { %v1032_v27 = vmax.f32 %v1012_v25, 0.0 }
 0x18e   : > { %v923_v36 = vpack.c.bf16 %v907_v30, %v907_v30  ;;  %v1347_v21 = vunpack.c.l.b16 %v1163_v6 }
 0x18f   : > { %v1048_v28 = vpack.c.bf16 %v1032_v27, %v1032_v27  ;;  %v1126_v7 = vpop.f32.mrf.mxu3  ;;  %v1185_v27 = vunpack.c.l.b16 %v604_v13 }
 0x190   : > { %v1236_v43 = vunpack.c.l.b16 %v923_v36  ;;  %v1127_v34 = vadd.f32 %v2171_v47, %v1126_v7  ;;  %v555_v36 = vadd.f32 %v2171_v47, %v2231_v31 }
 0x191   : > { %v1293_v14 = vunpack.c.l.b16 %v1048_v28  ;;  %v887_v9 = vpop.f32.mrf.mxu1 }
 0x192   : > { %v888_v32 = vadd.f32 %v2171_v47, %v887_v9  ;;  %v1014_v37 = vpop.f32.mrf.mxu2  ;;  %v1148_v23 = vmax.f32 %v1127_v34, 0.0  ;;  %v1184_v9 = vunpack.c.l.b16 %v603_v20 }
 0x193   : > { %v1015_v33 = vadd.f32 %v2171_v47, %v1014_v37  ;;  %v1302_v35 = vpack.c.b16 %v1293_v14, %v1292_v10  ;;  %v1346_v10 = vunpack.c.l.b16 %v1162_v60 }
 0x194   : > { %v908_v38 = vmax.f32 %v888_v32, 0.0  ;;  %v1164_v37 = vpack.c.bf16 %v1148_v23, %v1148_v23 }
 0x195   : > { %1316 = vrot.lane.b32.xlu2 %v1302_v35, %s1805_s11  ;;  %v1033_v41 = vmax.f32 %v1015_v33, 0.0  ;;  %v1357_v32 = vpack.c.b16 %v1347_v21, %v1346_v10  ;;  %v1200_v35 = vpack.c.b16 %v1185_v27, %v1184_v9 }
 0x196   : > { %v924_v39 = vpack.c.bf16 %v908_v38, %v908_v38 }
 0x197   : > { %v1128_v17 = vpop.f32.mrf.mxu3  ;;  %v1049_v26 = vpack.c.bf16 %v1033_v41, %v1033_v41 }
 0x198   : > { %v1237_v5 = vunpack.c.l.b16 %v924_v39  ;;  %v1129_v42 = vadd.f32 %v2171_v47, %v1128_v17 }
 0x199   : > { %v890_v44 = vpop.f32.mrf.mxu1  ;;  %v1294_v57 = vunpack.c.l.b16 %v1049_v26 }
 0x19a   : > { %v1016_v40 = vpop.f32.mrf.mxu2  ;;  %v1246_v45 = vpack.c.b16 %v1237_v5, %v1236_v43  ;;  %v891_v52 = vadd.f32 %v2171_v47, %v890_v44  ;;  %v1149_v16 = vmax.f32 %v1129_v42, 0.0  ;;  %v553_v43 = vadd.f32 %v2171_v47, %v2226_v18  ;;  %v1305_v5 = vpop.permute.xlu2 %1304 }
 0x19b   : > { %v1017_v49 = vadd.f32 %v2171_v47, %v1016_v40  ;;  %v562_v40 = vpop.f32.mrf.mxu0 }
 0x19c   : > { %1260 = vrot.lane.b32.xlu0 %v1246_v45, %s1802_s25  ;;  %v909_v61 = vmax.f32 %v891_v52, 0.0  ;;  %v1165_v28 = vpack.c.bf16 %v1149_v16, %v1149_v16  ;;  %v1348_v45 = vunpack.c.l.b16 %v1164_v37  ;;  %v589_v55 = vmax.f32 %v553_v43, 0.0 }
 0x19d   : > { %v1034_v54 = vmax.f32 %v1017_v49, 0.0  ;;  %v590_v49 = vmax.f32 %v555_v36, 0.0  ;;  %v592_v16 = vmax.f32 %v560_v1, 0.0 }
 0x19e   : > { %v925_v8 = vpack.c.bf16 %v909_v61, %v909_v61  ;;  %v1349_v38 = vunpack.c.l.b16 %v1165_v28 }
 0x19f   : > { %v1050_v58 = vpack.c.bf16 %v1034_v54, %v1034_v54  ;;  %v1131_v29 = vpop.f32.mrf.mxu3 }
 0x1a0   : > { %v1132_v59 = vadd.f32 %v2171_v47, %v1131_v29  ;;  %v1238_v24 = vunpack.c.l.b16 %v925_v8  ;;  %v1358_v54 = vpack.c.b16 %v1349_v38, %v1348_v45  ;;  %v558_v8 = vadd.f32 %v2171_v47, %v2238_v50 }
 0x1a1   : > { %v1295_v2 = vunpack.c.l.b16 %v1050_v58  ;;  %v892_v51 = vpop.f32.mrf.mxu1  ;;  %v605_v58 = vpack.c.bf16 %v589_v55, %v589_v55  ;;  %v563_v50 = vadd.f32 %v2171_v47, %v562_v40 }
 0x1a2   : > { %v893_v3 = vadd.f32 %v2171_v47, %v892_v51  ;;  %v1150_v0 = vmax.f32 %v1132_v59, 0.0 }
 0x1a3   : > { %v1303_v4 = vpack.c.b16 %v1295_v2, %v1294_v57  ;;  %v606_v57 = vpack.c.bf16 %v590_v49, %v590_v49  ;;  %v564_v61 = vpop.f32.mrf.mxu0  ;;  %v1186_v62 = vunpack.c.l.b16 %v605_v58 }
 0x1a4   : > { %v910_v11 = vmax.f32 %v893_v3, 0.0  ;;  %v1166_v7 = vpack.c.bf16 %v1150_v0, %v1150_v0  ;;  %v591_v0 = vmax.f32 %v558_v8, 0.0  ;;  %v565_v23 = vadd.f32 %v2171_v47, %v564_v61 }
 0x1a5   : > { %1318 = vrot.lane.b32.xlu0 %v1303_v4, %s1805_s11  ;;  %v1187_v29 = vunpack.c.l.b16 %v606_v57 }
 0x1a6   : > { %v926_v19 = vpack.c.bf16 %v910_v11, %v910_v11  ;;  %v1350_v39 = vunpack.c.l.b16 %v1166_v7  ;;  %v607_v20 = vpack.c.bf16 %v591_v0, %v591_v0  ;;  %v594_v27 = vmax.f32 %v565_v23, 0.0 }
 0x1a7   : > { %v1133_v22 = vpop.f32.mrf.mxu3  ;;  %v1201_v12 = vpack.c.b16 %v1187_v29, %v1186_v62 }
 0x1a8   : > { %v1239_v25 = vunpack.c.l.b16 %v926_v19  ;;  %v1134_v63 = vadd.f32 %v2171_v47, %v1133_v22  ;;  %v608_v19 = vpack.c.bf16 %v592_v16, %v592_v16  ;;  %v1188_v22 = vunpack.c.l.b16 %v607_v20 }
 0x1a9   : > { %v610_v37 = vpack.c.bf16 %v594_v27, %v594_v27 }
 0x1aa   : > { %v1151_v30 = vmax.f32 %v1134_v63, 0.0  ;;  %v1247_v14 = vpack.c.b16 %v1239_v25, %v1238_v24  ;;  %v1189_v21 = vunpack.c.l.b16 %v608_v19 }
 0x1ab   : > { %v567_v11 = vpop.f32.mrf.mxu0 }
 0x1ac   : > { %v1167_v33 = vpack.c.bf16 %v1151_v30, %v1151_v30  ;;  %1262 = vrot.lane.b32.xlu1 %v1247_v14, %s1802_s25  ;;  %s2275_s25 = scalar_lea.vmem %s2363_s3, %s1600_s13  ;;  %v1363_v59 = vpop.permute.xlu2 %1362  ;;  %v1202_v25 = vpack.c.b16 %v1189_v21, %v1188_v22  ;;  %v593_v30 = vmax.f32 %v563_v50, 0.0 }
 0x1ad   : > { %1370 = vrot.lane.b32.xlu0 %v1357_v32, %s1806_s19  ;;  %v1361_v46 = vpop.permute.xlu1 %1360 }
 0x1ae   : > { %v1351_v41 = vunpack.c.l.b16 %v1167_v33  ;;  %v1249_v17 = vpop.permute.xlu0 %1248  ;;  %v609_v38 = vpack.c.bf16 %v593_v30, %v593_v30 }
 0x1af   : > { %v1378_v44 = vsel %vm479_vm2, %v1200_v35, %v1249_v17 }
 0x1b0   : > { %v1401_v31 = vsel %vm521_vm3, %v1378_v44, %v1305_v5  ;;  %v1359_v26 = vpack.c.b16 %v1351_v41, %v1350_v39  ;;  %v1191_v39 = vunpack.c.l.b16 %v610_v37  ;;  %v1190_v41 = vunpack.c.l.b16 %v609_v38 }
 0x1b1   : > { %v1418_v52 = vsel %vm1416_vm5, %v1401_v31, %v1361_v46  ;;  %v568_v44 = vadd.f32 %v2171_v47, %v567_v11 }
 0x1b2   : > { %v1441_v53 = vunpack.c.l.b16 %v1418_v52  ;;  %v1442_v48 = vunpack.c.h.b16 %v1418_v52  ;;  %1374 = vrot.lane.b32.xlu2 %v1359_v26, %s1806_s19  ;;  %v1203_v5 = vpack.c.b16 %v1191_v39, %v1190_v41 }
 0x1b3   : > { %v569_v15 = vpop.f32.mrf.mxu0  ;;  %v595_v31 = vmax.f32 %v568_v44, 0.0 }
 0x1b4   : > { %v1457_v18 = vpack.c.b16 %v1441_v53, %v1441_v53  ;;  %v1458_v56 = vpack.c.b16 %v1442_v48, %v1442_v48  ;;  %1372 = vrot.lane.b32.xlu1 %v1358_v54, %s1806_s19  ;;  %v570_v17 = vadd.f32 %v2171_v47, %v569_v15 }
 0x1b6   : > { %1490 = vst.msk [vmem:[%s2275_s25] sm:$0xf] %vm1489_vm6, %v1457_v18  ;;  %v1253_v24 = vpop.permute.xlu2 %1252  ;;  %v596_v40 = vmax.f32 %v570_v17, 0.0  ;;  %v611_v18 = vpack.c.bf16 %v595_v31, %v595_v31 }
 0x1b7   : > { %1491 = vst.msk [vmem:[%s2275_s25 + $0x4] sm:$0xf] %vm1489_vm6, %v1458_v56  ;;  %v1307_v51 = vpop.permute.xlu0 %1306  ;;  %v1384_v10 = vsel %vm479_vm2, %v1202_v25, %v1253_v24 }
 0x1b8   : > { %v612_v53 = vpack.c.bf16 %v596_v40, %v596_v40  ;;  %v1192_v29 = vunpack.c.l.b16 %v611_v18 }
 0x1ba   : > { %v1193_v58 = vunpack.c.l.b16 %v612_v53 }
 0x1bb   : > { %v572_v33 = vpop.f32.mrf.mxu0 }
 0x1bc   : > { %v1204_v62 = vpack.c.b16 %v1193_v58, %v1192_v29  ;;  %v573_v0 = vadd.f32 %v2171_v47, %v572_v33 }
 0x1be   : > { %v1251_v2 = vpop.permute.xlu1 %1250  ;;  %v597_v24 = vmax.f32 %v573_v0, 0.0 }
 0x1bf   : > { %v1381_v42 = vsel %vm479_vm2, %v1201_v12, %v1251_v2  ;;  %v1311_v26 = vpop.permute.xlu2 %1310 }
 0x1c0   : > { %v1403_v3 = vsel %vm521_vm3, %v1381_v42, %v1307_v51 }
 0x1c1   : > { %v1420_v6 = vsel %vm1416_vm5, %v1403_v3, %v1363_v59 }
 0x1c2   : > { %v1443_v4 = vunpack.c.l.b16 %v1420_v6  ;;  %v1444_v34 = vunpack.c.h.b16 %v1420_v6 }
 0x1c3   : > { %v574_v46 = vpop.f32.mrf.mxu0 }
 0x1c4   : > { %v1459_v13 = vpack.c.b16 %v1443_v4, %v1443_v4  ;;  %v1460_v60 = vpack.c.b16 %v1444_v34, %v1444_v34 }
 0x1c6   : > { %1492 = vst.msk [vmem:[%s2275_s25 + $0x8] sm:$0xf] %vm1489_vm6, %v1459_v13 }
 0x1c7   : > { %1493 = vst.msk [vmem:[%s2275_s25 + $0xc] sm:$0xf] %vm1489_vm6, %v1460_v60  ;;  %v1309_v63 = vpop.permute.xlu1 %1308  ;;  %v575_v60 = vadd.f32 %v2171_v47, %v574_v46 }
 0x1c8   : > { %v1405_v28 = vsel %vm521_vm3, %v1384_v10, %v1309_v63 }
 0x1c9   : > { %v598_v15 = vmax.f32 %v575_v60, 0.0 }
 0x1cb   : > { %v577_v61 = vpop.f32.mrf.mxu0  ;;  %v614_v63 = vpack.c.bf16 %v598_v15, %v598_v15 }
 0x1cc   : > { %v578_v25 = vadd.f32 %v2171_v47, %v577_v61 }
 0x1ce   : > { %v599_v30 = vmax.f32 %v578_v25, 0.0 }
 0x1d0   : > { %v615_v38 = vpack.c.bf16 %v599_v30, %v599_v30 }
 0x1d2   : > { %v1196_v44 = vunpack.c.l.b16 %v615_v38 }
 0x1d3   : > { %v579_v8 = vpop.f32.mrf.mxu0 }
 0x1d4   : > { %v1365_v7 = vpop.permute.xlu0 %1364  ;;  %v580_v22 = vadd.f32 %v2171_v47, %v579_v8 }
 0x1d5   : > { %v1422_v14 = vsel %vm1416_vm5, %v1405_v28, %v1365_v7  ;;  %v613_v28 = vpack.c.bf16 %v597_v24, %v597_v24 }
 0x1d6   : > { %v1445_v9 = vunpack.c.l.b16 %v1422_v14  ;;  %v1446_v32 = vunpack.c.h.b16 %v1422_v14  ;;  %v600_v27 = vmax.f32 %v580_v22, 0.0 }
 0x1d8   : > { %v1461_v35 = vpack.c.b16 %v1445_v9, %v1445_v9  ;;  %v1462_v36 = vpack.c.b16 %v1446_v32, %v1446_v32  ;;  %v1195_v32 = vunpack.c.l.b16 %v614_v63  ;;  %v616_v33 = vpack.c.bf16 %v600_v27, %v600_v27 }
 0x1da   : > { %1494 = vst.msk [vmem:[%s2275_s25 + $0x10] sm:$0xf] %vm1489_vm6, %v1461_v35  ;;  %v1197_v17 = vunpack.c.l.b16 %v616_v33 }
 0x1db   : > { %1495 = vst.msk [vmem:[%s2275_s25 + $0x14] sm:$0xf] %vm1489_vm6, %v1462_v36  ;;  %v582_v11 = vpop.f32.mrf.mxu0  ;;  %v1194_v36 = vunpack.c.l.b16 %v613_v28 }
 0x1dc   : > { %v1369_v42 = vpop.permute.xlu2 %1368  ;;  %v583_v21 = vadd.f32 %v2171_v47, %v582_v11 }
 0x1dd   : > { %v1205_v41 = vpack.c.b16 %v1195_v32, %v1194_v36 }
 0x1de   : > { %v1255_v43 = vpop.permute.xlu0 %1254  ;;  %v601_v50 = vmax.f32 %v583_v21, 0.0 }
 0x1df   : > { %v1387_v45 = vsel %vm479_vm2, %v1203_v5, %v1255_v43 }
 0x1e0   : > { %v1407_v52 = vsel %vm521_vm3, %v1387_v45, %v1311_v26  ;;  %v617_v14 = vpack.c.bf16 %v601_v50, %v601_v50 }
 0x1e2   : > { %v1198_v39 = vunpack.c.l.b16 %v617_v14 }
 0x1e3   : > { %v584_v13 = vpop.f32.mrf.mxu0 }
 0x1e4   : > { %v1367_v49 = vpop.permute.xlu1 %1366  ;;  %v585_v16 = vadd.f32 %v2171_v47, %v584_v13 }
 0x1e5   : > { %v1424_v48 = vsel %vm1416_vm5, %v1407_v52, %v1367_v49  ;;  %v1206_v52 = vpack.c.b16 %v1197_v17, %v1196_v44 }
 0x1e6   : > { %v1447_v54 = vunpack.c.l.b16 %v1424_v48  ;;  %v1448_v55 = vunpack.c.h.b16 %v1424_v48  ;;  %v1259_v19 = vpop.permute.xlu2 %1258  ;;  %v602_v23 = vmax.f32 %v585_v16, 0.0 }
 0x1e7   : > { %v1313_v2 = vpop.permute.xlu0 %1312  ;;  %v1393_v47 = vsel %vm479_vm2, %v1205_v41, %v1259_v19 }
 0x1e8   : > { %v1463_v56 = vpack.c.b16 %v1447_v54, %v1447_v54  ;;  %v1464_v57 = vpack.c.b16 %v1448_v55, %v1448_v55  ;;  %v618_v10 = vpack.c.bf16 %v602_v23, %v602_v23 }
 0x1ea   : > { %1496 = vst.msk [vmem:[%s2275_s25 + $0x18] sm:$0xf] %vm1489_vm6, %v1463_v56  ;;  %v1199_v35 = vunpack.c.l.b16 %v618_v10 }
 0x1eb   : > { %1497 = vst.msk [vmem:[%s2275_s25 + $0x1c] sm:$0xf] %vm1489_vm6, %v1464_v57 }
 0x1ec   : > { %v1207_v43 = vpack.c.b16 %v1199_v35, %v1198_v39 }
 0x1ee   : > { %v1257_v12 = vpop.permute.xlu1 %1256 }
 0x1ef   : > { %v1390_v51 = vsel %vm479_vm2, %v1204_v62, %v1257_v12  ;;  %v1317_v37 = vpop.permute.xlu2 %1316 }
 0x1f0   : > { %v1409_v59 = vsel %vm521_vm3, %v1390_v51, %v1313_v2 }
 0x1f1   : > { %v1426_v3 = vsel %vm1416_vm5, %v1409_v59, %v1369_v42 }
 0x1f2   : > { %v1449_v1 = vunpack.c.l.b16 %v1426_v3  ;;  %v1450_v6 = vunpack.c.h.b16 %v1426_v3 }
 0x1f4   : > { %v1465_v4 = vpack.c.b16 %v1449_v1, %v1449_v1  ;;  %v1466_v34 = vpack.c.b16 %v1450_v6, %v1450_v6 }
 0x1f6   : > { %1498 = vst.msk [vmem:[%s2275_s25 + $0x20] sm:$0xf] %vm1489_vm6, %v1465_v4 }
 0x1f7   : > { %1499 = vst.msk [vmem:[%s2275_s25 + $0x24] sm:$0xf] %vm1489_vm6, %v1466_v34  ;;  %v1315_v7 = vpop.permute.xlu1 %1314 }
 0x1f8   : > { %v1411_v40 = vsel %vm521_vm3, %v1393_v47, %v1315_v7 }
 0x20c   : > { %v1375_v31 = vpop.permute.xlu2 %1374 }
 0x20e   : > { %v1261_v20 = vpop.permute.xlu0 %1260 }
 0x20f   : > { %v1396_v56 = vsel %vm479_vm2, %v1206_v52, %v1261_v20 }
 0x210   : > { %v1413_v12 = vsel %vm521_vm3, %v1396_v56, %v1317_v37 }
 0x217   : > { %v1319_v9 = vpop.permute.xlu0 %1318 }
 0x21e   : > { %v1263_v5 = vpop.permute.xlu1 %1262 }
 0x21f   : > { %v1399_v45 = vsel %vm479_vm2, %v1207_v43, %v1263_v5  ;;  %v1371_v46 = vpop.permute.xlu0 %1370 }
 0x220   : > { %v1415_v26 = vsel %vm521_vm3, %v1399_v45, %v1319_v9  ;;  %v1428_v49 = vsel %vm1416_vm5, %v1411_v40, %v1371_v46 }
 0x221   : > { %v1432_v53 = vsel %vm1416_vm5, %v1415_v26, %v1375_v31  ;;  %v1451_v48 = vunpack.c.l.b16 %v1428_v49  ;;  %v1452_v54 = vunpack.c.h.b16 %v1428_v49 }
 0x222   : > { %v1455_v55 = vunpack.c.l.b16 %v1432_v53  ;;  %v1456_v18 = vunpack.c.h.b16 %v1432_v53 }
 0x223   : > { %v1467_v57 = vpack.c.b16 %v1451_v48, %v1451_v48  ;;  %v1468_v61 = vpack.c.b16 %v1452_v54, %v1452_v54 }
 0x224   : > { %v1471_v58 = vpack.c.b16 %v1455_v55, %v1455_v55  ;;  %v1472_v29 = vpack.c.b16 %v1456_v18, %v1456_v18 }
 0x225   : > { %1500 = vst.msk [vmem:[%s2275_s25 + $0x28] sm:$0xf] %vm1489_vm6, %v1467_v57 }
 0x226   : > { %1504 = vst.msk [vmem:[%s2275_s25 + $0x38] sm:$0xf] %vm1489_vm6, %v1471_v58  ;;  %v1373_v62 = vpop.permute.xlu1 %1372 }
 0x227   : > { %1505 = vst.msk [vmem:[%s2275_s25 + $0x3c] sm:$0xf] %vm1489_vm6, %v1472_v29  ;;  %v1430_v2 = vsel %vm1416_vm5, %v1413_v12, %v1373_v62 }
 0x228   : > { %1501 = vst.msk [vmem:[%s2275_s25 + $0x2c] sm:$0xf] %vm1489_vm6, %v1468_v61  ;;  %v1453_v51 = vunpack.c.l.b16 %v1430_v2  ;;  %v1454_v42 = vunpack.c.h.b16 %v1430_v2 }
 0x22a   : > { %v1469_v59 = vpack.c.b16 %v1453_v51, %v1453_v51  ;;  %v1470_v3 = vpack.c.b16 %v1454_v42, %v1454_v42 }
 0x22c   : > { %1502 = vst.msk [vmem:[%s2275_s25 + $0x30] sm:$0xf] %vm1489_vm6, %v1469_v59 }
 0x22d   : > { %1503 = vst.msk [vmem:[%s2275_s25 + $0x34] sm:$0xf] %vm1489_vm6, %v1470_v3 }
 0x22e PF: > { %s13_s16 = sadd.s32 1, %s1800_s16   ;;  %s2365_s12 = smov %s1792_s14 }
 0x22f   : > { %p10_p7 = scmp.ge.s32.totalorder %s13_s16, 6   ;;  %s2366_s13 = smov %s1796_s15 }
 0x230   : > { %s2367_s14 = smov %s2370_s17  ;;  %s2368_s15 = smov %s2374_s18 }
 0x231   :  { %12 = sbr.rel (!%p10_p7) target bundleno = 3 (0x3), region = 66 }

</bundles_post_ra>
